<compile_context>
chip_gen: v7x
topology: tpu7x:2x2x1
jax: 0.10.0
libtpu: 0.0.40
codegen_flags: <defaults>
</compile_context>

<pallas_src>
import numpy as np
import jax
import jax.numpy as jnp
from jax import lax
from jax.experimental import pallas as pl
from jax.experimental.pallas import tpu as pltpu


def _round_up(x, m):
    return (x + m - 1) // m * m


def _fold_bn_into_conv(w_oihw, gamma, beta, mean, var, eps):
    """BN (inference) after a bias-free conv == rescaled weights + per-channel shift."""
    scale = gamma / jnp.sqrt(var + eps)                           # (Cout,)
    w_f = (w_oihw * scale[:, None, None, None]).astype(jnp.float32)
    shift = (beta - mean * scale).astype(jnp.float32)
    return w_f, shift


def _edge_masks_np(H, W):
    """(9, H*W) validity masks for the 9 taps of a SAME 3x3 conv (host precompute)."""
    HW = H * W
    pos = np.arange(HW)
    row, col = pos // W, pos % W
    m = np.zeros((9, HW), np.float32)
    k = 0
    for ky in range(3):
        for kx in range(3):
            dy, dx = ky - 1, kx - 1
            valid = ((row + dy >= 0) & (row + dy < H) &
                     (col + dx >= 0) & (col + dx < W))
            m[k] = valid.astype(np.float32)
            k += 1
    return m


def _pick_images_per_block(N, HW, target_lanes=1024):
    """Images stacked on the lane axis per grid step (bounds VMEM, fills MXU N)."""
    cap = max(1, target_lanes // HW)
    nb = 1
    for d in range(1, min(cap, N) + 1):
        if N % d == 0:
            nb = d
    if (nb * HW) % 128 != 0:
        nb = N  # full lane extent of the array is always layout-legal
    return nb


def _make_basic_block_kernel(H, W, NB, Cin, Cin_p, Cout, has_downsample):
    HW = H * W
    L = NB * HW
    taps = [(ky, kx) for ky in range(3) for kx in range(3)]

    def conv_taps(a, masks, w_taps):
        """SAME 3x3 conv as 9 accumulating per-tap MXU matmuls.

        a:      (C, L)  f32 activation slab (channels on sublanes, NB*HW on lanes)
        masks:  (9, L)  f32 tap-validity masks (zero the roll wrap / image edges)
        w_taps: (9, M, C) bf16 per-tap weights
        returns (M, L) f32 accumulator.
        """
        acc = jnp.zeros((w_taps.shape[1], L), jnp.float32)
        for k, (ky, kx) in enumerate(taps):
            d = (ky - 1) * W + (kx - 1)
            if d == 0:
                tap = a                                       # center tap, always valid
            else:
                tap = pltpu.roll(a, shift=(-d) % L, axis=1) * masks[k:k + 1, :]
            acc = acc + jnp.dot(w_taps[k], tap.astype(jnp.bfloat16),
                                preferred_element_type=jnp.float32)
        return acc

    def kernel(x_ref, m_ref, w1_ref, s1_ref, w2_ref, s2_ref, *rest):
        if has_downsample:
            sd_ref, out_ref = rest
        else:
            (out_ref,) = rest

        x = x_ref[...].astype(jnp.float32)                    # (Cin, L)
        masks = m_ref[...]                                    # (9, L)  f32
        w1 = w1_ref[...]                                      # (9, M1, Cin_p) bf16
        w2 = w2_ref[...]                                      # (9, Cout, Cout) bf16

        # Pad input channels to a sublane multiple inside VMEM (no HBM pad pass).
        if Cin_p != Cin:
            x_p = jnp.concatenate(
                [x, jnp.zeros((Cin_p - Cin, L), x.dtype)], axis=0)
        else:
            x_p = x

        # conv1 + BN1 (with the 1x1 shortcut fused in as extra output rows), ReLU.
        acc1 = conv_taps(x_p, masks, w1)                      # (M1, L) f32
        h = jnp.maximum(acc1[:Cout] + s1_ref[...], 0.0)       # (Cout, L) f32

        # conv2 + BN2.
        res = conv_taps(h, masks, w2) + s2_ref[...]           # (Cout, L) f32

        # Shortcut: fused 1x1 conv rows (+ BN shift), or identity.
        if has_downsample:
            sc = acc1[Cout:] + sd_ref[...]
        else:
            sc = x                                            # Cin == Cout

        out_ref[...] = jnp.maximum(sc + res, 0.0).astype(out_ref.dtype)

    return kernel


def basic_block_forward(x_nchw,
                        w1, bn1_gamma, bn1_beta, bn1_mean, bn1_var,
                        w2, bn2_gamma, bn2_beta, bn2_mean, bn2_var,
                        wd=None, bnd_gamma=None, bnd_beta=None,
                        bnd_mean=None, bnd_var=None,
                        stride=1, eps=1e-5):
    """BasicBlock forward (inference-mode BN). NCHW in -> NCHW out."""
    # TODO(synk): stride > 1 (strided 3x3 + strided 1x1 shortcut) not implemented.
    assert stride == 1, "only stride=1 is supported"
    N, Cin, H, W = x_nchw.shape
    Cout = w1.shape[0]
    HW = H * W
    has_downsample = wd is not None
    assert has_downsample or Cin == Cout

    Cin_p = _round_up(Cin, 8)      # activations padded to this many sublanes in VMEM
    M1 = 2 * Cout if has_downsample else Cout

    # ---- fold BN into conv weights; build per-tap weight stacks (bf16) ----
    w1f, shift1 = _fold_bn_into_conv(w1, bn1_gamma, bn1_beta, bn1_mean, bn1_var, eps)
    w2f, shift2 = _fold_bn_into_conv(w2, bn2_gamma, bn2_beta, bn2_mean, bn2_var, eps)

    w1f = jnp.pad(w1f, ((0, 0), (0, Cin_p - Cin), (0, 0), (0, 0)))
    # (Cout, Cin_p, 3, 3) -> (ky, kx, Cout, Cin_p) -> (9, Cout, Cin_p); k = ky*3 + kx
    w1_taps = jnp.transpose(w1f, (2, 3, 0, 1)).reshape(9, Cout, Cin_p)
    if has_downsample:
        wdf, shiftd = _fold_bn_into_conv(wd, bnd_gamma, bnd_beta, bnd_mean, bnd_var, eps)
        wd_mat = jnp.pad(wdf[:, :, 0, 0], ((0, 0), (0, Cin_p - Cin)))   # (Cout, Cin_p)
        # The center tap of the 3x3 is exactly x, so the 1x1 shortcut rides along
        # as extra output rows of conv1's center-tap matmul (zero for other taps).
        sc_rows = jnp.zeros((9, Cout, Cin_p), jnp.float32).at[4].set(wd_mat)
        w1_taps = jnp.concatenate([w1_taps, sc_rows], axis=1)           # (9, 2*Cout, Cin_p)
    w1_taps = w1_taps.astype(jnp.bfloat16)
    w2_taps = jnp.transpose(w2f, (2, 3, 0, 1)).reshape(9, Cout, Cout).astype(jnp.bfloat16)

    # ---- activations: (N,C,H,W) -> (C, N*HW); batch stacked on the lane axis ----
    NB = _pick_images_per_block(N, HW)
    L = NB * HW
    x_cl = jnp.transpose(x_nchw.reshape(N, Cin, HW), (1, 0, 2)).reshape(Cin, N * HW)

    # Host-precomputed tap masks, tiled across the NB images in a block.
    masks = jnp.asarray(np.tile(_edge_masks_np(H, W), (1, NB)), dtype=jnp.float32)

    args = [x_cl, masks, w1_taps,
            shift1.reshape(Cout, 1), w2_taps, shift2.reshape(Cout, 1)]
    in_specs = [
        pl.BlockSpec((Cin, L), lambda i: (0, i)),
        pl.BlockSpec((9, L), lambda i: (0, 0)),
        pl.BlockSpec((9, M1, Cin_p), lambda i: (0, 0, 0)),
        pl.BlockSpec((Cout, 1), lambda i: (0, 0)),
        pl.BlockSpec((9, Cout, Cout), lambda i: (0, 0, 0)),
        pl.BlockSpec((Cout, 1), lambda i: (0, 0)),
    ]
    if has_downsample:
        args.append(shiftd.reshape(Cout, 1))
        in_specs.append(pl.BlockSpec((Cout, 1), lambda i: (0, 0)))

    out2d = pl.pallas_call(
        _make_basic_block_kernel(H, W, NB, Cin, Cin_p, Cout, has_downsample),
        out_shape=jax.ShapeDtypeStruct((Cout, N * HW), x_nchw.dtype),
        grid_spec=pltpu.PrefetchScalarGridSpec(
            num_scalar_prefetch=0,
            grid=(N // NB,),
            in_specs=in_specs,
            out_specs=pl.BlockSpec((Cout, L), lambda i: (0, i)),
        ),
        compiler_params=pltpu.CompilerParams(
            dimension_semantics=("parallel",),
            vmem_limit_bytes=32 * 1024 * 1024,
        ),
    )(*args)

    return jnp.transpose(out2d.reshape(Cout, N, HW), (1, 0, 2)).reshape(N, Cout, H, W)


def _reference_forward(x, w1, g1, b1, m1, v1, w2, g2, b2, m2, v2,
                       wd=None, gd=None, bd=None, md=None, vd=None,
                       stride=1, eps=1e-5):
    """Pure-JAX reference (lax.conv, NCHW, f32) for correctness check."""
    dn = ("NCHW", "OIHW", "NCHW")

    def bn(a, g, b, m, v):
        g = g.reshape(1, -1, 1, 1); b = b.reshape(1, -1, 1, 1)
        m = m.reshape(1, -1, 1, 1); v = v.reshape(1, -1, 1, 1)
        return (a - m) / jnp.sqrt(v + eps) * g + b

    r = lax.conv_general_dilated(x, w1, (stride, stride), ((1, 1), (1, 1)),
                                 dimension_numbers=dn)
    r = jnp.maximum(bn(r, g1, b1, m1, v1), 0.0)
    r = lax.conv_general_dilated(r, w2, (1, 1), ((1, 1), (1, 1)),
                                 dimension_numbers=dn)
    r = bn(r, g2, b2, m2, v2)
    if wd is not None:
        sc = lax.conv_general_dilated(x, wd, (stride, stride), ((0, 0), (0, 0)),
                                      dimension_numbers=dn)
        sc = bn(sc, gd, bd, md, vd)
    else:
        sc = x
    return jnp.maximum(sc + r, 0.0)


if __name__ == "__main__":
    def bn_params(k, C):
        k1, k2, k3, k4 = jax.random.split(k, 4)
        gamma = 1.0 + 0.1 * jax.random.normal(k1, (C,), jnp.float32)
        beta = 0.1 * jax.random.normal(k2, (C,), jnp.float32)
        mean = 0.1 * jax.random.normal(k3, (C,), jnp.float32)
        var = jax.random.uniform(k4, (C,), jnp.float32, minval=0.5, maxval=1.5)
        return gamma, beta, mean, var

    def check(out, ref):
        assert out.shape == ref.shape, (out.shape, ref.shape)
        err = float(jnp.max(jnp.abs(out - ref)))
        scale = float(jnp.max(jnp.abs(ref)))
        rel_l2 = float(jnp.linalg.norm((out - ref).ravel()) /
                       (jnp.linalg.norm(ref.ravel()) + 1e-12))
        # bf16 MXU operands with f32 accumulation -> loosened tolerance.
        assert err <= 4e-2 * scale + 1e-3, (err, scale)
        assert rel_l2 <= 2.5e-2, rel_l2

    key = jax.random.PRNGKey(0)

    # --- case 1: BasicBlock(4 -> 32, stride=1): 1x1-conv + BN shortcut ---
    N, Cin, H, W, Cout = 2, 4, 16, 16, 32
    ks = jax.random.split(key, 8)
    x = jax.random.normal(ks[0], (N, Cin, H, W), jnp.float32)
    w1 = jax.random.normal(ks[1], (Cout, Cin, 3, 3), jnp.float32) * (2.0 / (9 * Cin)) ** 0.5
    w2 = jax.random.normal(ks[2], (Cout, Cout, 3, 3), jnp.float32) * (2.0 / (9 * Cout)) ** 0.5
    wd = jax.random.normal(ks[3], (Cout, Cin, 1, 1), jnp.float32) * (2.0 / Cin) ** 0.5
    g1, b1, m1, v1 = bn_params(ks[4], Cout)
    g2, b2, m2, v2 = bn_params(ks[5], Cout)
    gd, bd, md, vd = bn_params(ks[6], Cout)

    out = jax.block_until_ready(
        basic_block_forward(x, w1, g1, b1, m1, v1, w2, g2, b2, m2, v2,
                            wd, gd, bd, md, vd))
    ref = _reference_forward(x, w1, g1, b1, m1, v1, w2, g2, b2, m2, v2,
                             wd, gd, bd, md, vd)
    check(out, ref)

    # --- case 2: BasicBlock(32 -> 32, stride=1): identity shortcut ---
    Cin2 = Cout
    ks2 = jax.random.split(ks[7], 5)
    x2 = jax.random.normal(ks2[0], (N, Cin2, H, W), jnp.float32)
    w1b = jax.random.normal(ks2[1], (Cout, Cin2, 3, 3), jnp.float32) * (2.0 / (9 * Cin2)) ** 0.5
    w2b = jax.random.normal(ks2[2], (Cout, Cout, 3, 3), jnp.float32) * (2.0 / (9 * Cout)) ** 0.5
    g1b, b1b, m1b, v1b = bn_params(ks2[3], Cout)
    g2b, b2b, m2b, v2b = bn_params(ks2[4], Cout)

    out2 = jax.block_until_ready(
        basic_block_forward(x2, w1b, g1b, b1b, m1b, v1b, w2b, g2b, b2b, m2b, v2b))
    ref2 = _reference_forward(x2, w1b, g1b, b1b, m1b, v1b, w2b, g2b, b2b, m2b, v2b)
    check(out2, ref2)

    print("KERNEL_OK")
</pallas_src>

<mosaic_0001>
module attributes {stable_mosaic.version = 11 : i64} {
  func.func @kernel(%arg0: i32, %arg1: memref<4x512xf32, #tpu.memory_space<vmem>>, %arg2: memref<9x512xf32, #tpu.memory_space<vmem>>, %arg3: memref<9x64x8xbf16, #tpu.memory_space<vmem>>, %arg4: memref<32x1xf32, #tpu.memory_space<vmem>>, %arg5: memref<9x32x32xbf16, #tpu.memory_space<vmem>>, %arg6: memref<32x1xf32, #tpu.memory_space<vmem>>, %arg7: memref<32x1xf32, #tpu.memory_space<vmem>>, %arg8: memref<32x512xf32, #tpu.memory_space<vmem>>) attributes {dimension_semantics = [#tpu.dimension_semantics<parallel>], iteration_bounds = array<i64: 1>, scalar_prefetch = 0 : i64, scratch_operands = 0 : i64, tpu.core_type = #tpu.core_type<tc>, window_params = [{transform_indices = @transform_0, window_bounds = array<i64: 4, 512>}, {pipeline_mode = #tpu.pipeline_mode<synchronous>, transform_indices = @transform_1, window_bounds = array<i64: 9, 512>}, {pipeline_mode = #tpu.pipeline_mode<synchronous>, transform_indices = @transform_2, window_bounds = array<i64: 9, 64, 8>}, {pipeline_mode = #tpu.pipeline_mode<synchronous>, transform_indices = @transform_3, window_bounds = array<i64: 32, 1>}, {pipeline_mode = #tpu.pipeline_mode<synchronous>, transform_indices = @transform_4, window_bounds = array<i64: 9, 32, 32>}, {pipeline_mode = #tpu.pipeline_mode<synchronous>, transform_indices = @transform_5, window_bounds = array<i64: 32, 1>}, {pipeline_mode = #tpu.pipeline_mode<synchronous>, transform_indices = @transform_6, window_bounds = array<i64: 32, 1>}, {transform_indices = @transform_7, window_bounds = array<i64: 32, 512>}]} {
    %c0 = arith.constant 0 : index
    %c0_0 = arith.constant 0 : index
    %0 = vector.load %arg1[%c0, %c0_0] : memref<4x512xf32, #tpu.memory_space<vmem>>, vector<4x512xf32>
    %c0_1 = arith.constant 0 : index
    %c0_2 = arith.constant 0 : index
    %1 = vector.load %arg2[%c0_1, %c0_2] : memref<9x512xf32, #tpu.memory_space<vmem>>, vector<9x512xf32>
    %c0_3 = arith.constant 0 : index
    %c0_4 = arith.constant 0 : index
    %c0_5 = arith.constant 0 : index
    %2 = vector.load %arg3[%c0_3, %c0_4, %c0_5] : memref<9x64x8xbf16, #tpu.memory_space<vmem>>, vector<9x64x8xbf16>
    %c0_6 = arith.constant 0 : index
    %c0_7 = arith.constant 0 : index
    %c0_8 = arith.constant 0 : index
    %3 = vector.load %arg5[%c0_6, %c0_7, %c0_8] : memref<9x32x32xbf16, #tpu.memory_space<vmem>>, vector<9x32x32xbf16>
    %cst = arith.constant 0.000000e+00 : f32
    %4 = vector.broadcast %cst : f32 to vector<4x512xf32>
    %5 = tpu.concatenate %0, %4 in 0 : vector<4x512xf32>, vector<4x512xf32> -> vector<8x512xf32>
    %cst_9 = arith.constant 0.000000e+00 : f32
    %6 = vector.broadcast %cst_9 : f32 to vector<64x512xf32>
    %c17_i32 = arith.constant 17 : i32
    %7 = tpu.dynamic_rotate %5 by %c17_i32 dim 1 : vector<8x512xf32>, i32 -> vector<8x512xf32>
    %8 = vector.extract_strided_slice %1 {offsets = [0, 0], sizes = [1, 512], strides = [1, 1]} : vector<9x512xf32> to vector<1x512xf32>
    %9 = vector.broadcast %8 : vector<1x512xf32> to vector<8x512xf32>
    %10 = arith.mulf %7, %9 : vector<8x512xf32>
    %11 = vector.extract_strided_slice %2 {offsets = [0, 0, 0], sizes = [1, 64, 8], strides = [1, 1, 1]} : vector<9x64x8xbf16> to vector<1x64x8xbf16>
    %12 = vector.shape_cast %11 : vector<1x64x8xbf16> to vector<64x8xbf16>
    %13 = arith.truncf %10 : vector<8x512xf32> to vector<8x512xbf16>
    %cst_10 = arith.constant dense<0.000000e+00> : vector<64x512xf32>
    %14 = tpu.matmul %12, %13, %cst_10 {dimension_numbers = #tpu.dot_dimension_numbers<[1], [0], [0], [1], [0, 0, 1, 1], [], []>} : vector<64x8xbf16>, vector<8x512xbf16>, vector<64x512xf32> -> vector<64x512xf32>
    %15 = arith.addf %6, %14 : vector<64x512xf32>
    %c16_i32 = arith.constant 16 : i32
    %16 = tpu.dynamic_rotate %5 by %c16_i32 dim 1 : vector<8x512xf32>, i32 -> vector<8x512xf32>
    %17 = vector.extract_strided_slice %1 {offsets = [1, 0], sizes = [1, 512], strides = [1, 1]} : vector<9x512xf32> to vector<1x512xf32>
    %18 = vector.broadcast %17 : vector<1x512xf32> to vector<8x512xf32>
    %19 = arith.mulf %16, %18 : vector<8x512xf32>
    %20 = vector.extract_strided_slice %2 {offsets = [1, 0, 0], sizes = [1, 64, 8], strides = [1, 1, 1]} : vector<9x64x8xbf16> to vector<1x64x8xbf16>
    %21 = vector.shape_cast %20 : vector<1x64x8xbf16> to vector<64x8xbf16>
    %22 = arith.truncf %19 : vector<8x512xf32> to vector<8x512xbf16>
    %cst_11 = arith.constant dense<0.000000e+00> : vector<64x512xf32>
    %23 = tpu.matmul %21, %22, %cst_11 {dimension_numbers = #tpu.dot_dimension_numbers<[1], [0], [0], [1], [0, 0, 1, 1], [], []>} : vector<64x8xbf16>, vector<8x512xbf16>, vector<64x512xf32> -> vector<64x512xf32>
    %24 = arith.addf %15, %23 : vector<64x512xf32>
    %c15_i32 = arith.constant 15 : i32
    %25 = tpu.dynamic_rotate %5 by %c15_i32 dim 1 : vector<8x512xf32>, i32 -> vector<8x512xf32>
    %26 = vector.extract_strided_slice %1 {offsets = [2, 0], sizes = [1, 512], strides = [1, 1]} : vector<9x512xf32> to vector<1x512xf32>
    %27 = vector.broadcast %26 : vector<1x512xf32> to vector<8x512xf32>
    %28 = arith.mulf %25, %27 : vector<8x512xf32>
    %29 = vector.extract_strided_slice %2 {offsets = [2, 0, 0], sizes = [1, 64, 8], strides = [1, 1, 1]} : vector<9x64x8xbf16> to vector<1x64x8xbf16>
    %30 = vector.shape_cast %29 : vector<1x64x8xbf16> to vector<64x8xbf16>
    %31 = arith.truncf %28 : vector<8x512xf32> to vector<8x512xbf16>
    %cst_12 = arith.constant dense<0.000000e+00> : vector<64x512xf32>
    %32 = tpu.matmul %30, %31, %cst_12 {dimension_numbers = #tpu.dot_dimension_numbers<[1], [0], [0], [1], [0, 0, 1, 1], [], []>} : vector<64x8xbf16>, vector<8x512xbf16>, vector<64x512xf32> -> vector<64x512xf32>
    %33 = arith.addf %24, %32 : vector<64x512xf32>
    %c1_i32 = arith.constant 1 : i32
    %34 = tpu.dynamic_rotate %5 by %c1_i32 dim 1 : vector<8x512xf32>, i32 -> vector<8x512xf32>
    %35 = vector.extract_strided_slice %1 {offsets = [3, 0], sizes = [1, 512], strides = [1, 1]} : vector<9x512xf32> to vector<1x512xf32>
    %36 = vector.broadcast %35 : vector<1x512xf32> to vector<8x512xf32>
    %37 = arith.mulf %34, %36 : vector<8x512xf32>
    %38 = vector.extract_strided_slice %2 {offsets = [3, 0, 0], sizes = [1, 64, 8], strides = [1, 1, 1]} : vector<9x64x8xbf16> to vector<1x64x8xbf16>
    %39 = vector.shape_cast %38 : vector<1x64x8xbf16> to vector<64x8xbf16>
    %40 = arith.truncf %37 : vector<8x512xf32> to vector<8x512xbf16>
    %cst_13 = arith.constant dense<0.000000e+00> : vector<64x512xf32>
    %41 = tpu.matmul %39, %40, %cst_13 {dimension_numbers = #tpu.dot_dimension_numbers<[1], [0], [0], [1], [0, 0, 1, 1], [], []>} : vector<64x8xbf16>, vector<8x512xbf16>, vector<64x512xf32> -> vector<64x512xf32>
    %42 = arith.addf %33, %41 : vector<64x512xf32>
    %43 = vector.extract_strided_slice %2 {offsets = [4, 0, 0], sizes = [1, 64, 8], strides = [1, 1, 1]} : vector<9x64x8xbf16> to vector<1x64x8xbf16>
    %44 = vector.shape_cast %43 : vector<1x64x8xbf16> to vector<64x8xbf16>
    %45 = arith.truncf %5 : vector<8x512xf32> to vector<8x512xbf16>
    %cst_14 = arith.constant dense<0.000000e+00> : vector<64x512xf32>
    %46 = tpu.matmul %44, %45, %cst_14 {dimension_numbers = #tpu.dot_dimension_numbers<[1], [0], [0], [1], [0, 0, 1, 1], [], []>} : vector<64x8xbf16>, vector<8x512xbf16>, vector<64x512xf32> -> vector<64x512xf32>
    %47 = arith.addf %42, %46 : vector<64x512xf32>
    %c511_i32 = arith.constant 511 : i32
    %48 = tpu.dynamic_rotate %5 by %c511_i32 dim 1 : vector<8x512xf32>, i32 -> vector<8x512xf32>
    %49 = vector.extract_strided_slice %1 {offsets = [5, 0], sizes = [1, 512], strides = [1, 1]} : vector<9x512xf32> to vector<1x512xf32>
    %50 = vector.broadcast %49 : vector<1x512xf32> to vector<8x512xf32>
    %51 = arith.mulf %48, %50 : vector<8x512xf32>
    %52 = vector.extract_strided_slice %2 {offsets = [5, 0, 0], sizes = [1, 64, 8], strides = [1, 1, 1]} : vector<9x64x8xbf16> to vector<1x64x8xbf16>
    %53 = vector.shape_cast %52 : vector<1x64x8xbf16> to vector<64x8xbf16>
    %54 = arith.truncf %51 : vector<8x512xf32> to vector<8x512xbf16>
    %cst_15 = arith.constant dense<0.000000e+00> : vector<64x512xf32>
    %55 = tpu.matmul %53, %54, %cst_15 {dimension_numbers = #tpu.dot_dimension_numbers<[1], [0], [0], [1], [0, 0, 1, 1], [], []>} : vector<64x8xbf16>, vector<8x512xbf16>, vector<64x512xf32> -> vector<64x512xf32>
    %56 = arith.addf %47, %55 : vector<64x512xf32>
    %c497_i32 = arith.constant 497 : i32
    %57 = tpu.dynamic_rotate %5 by %c497_i32 dim 1 : vector<8x512xf32>, i32 -> vector<8x512xf32>
    %58 = vector.extract_strided_slice %1 {offsets = [6, 0], sizes = [1, 512], strides = [1, 1]} : vector<9x512xf32> to vector<1x512xf32>
    %59 = vector.broadcast %58 : vector<1x512xf32> to vector<8x512xf32>
    %60 = arith.mulf %57, %59 : vector<8x512xf32>
    %61 = vector.extract_strided_slice %2 {offsets = [6, 0, 0], sizes = [1, 64, 8], strides = [1, 1, 1]} : vector<9x64x8xbf16> to vector<1x64x8xbf16>
    %62 = vector.shape_cast %61 : vector<1x64x8xbf16> to vector<64x8xbf16>
    %63 = arith.truncf %60 : vector<8x512xf32> to vector<8x512xbf16>
    %cst_16 = arith.constant dense<0.000000e+00> : vector<64x512xf32>
    %64 = tpu.matmul %62, %63, %cst_16 {dimension_numbers = #tpu.dot_dimension_numbers<[1], [0], [0], [1], [0, 0, 1, 1], [], []>} : vector<64x8xbf16>, vector<8x512xbf16>, vector<64x512xf32> -> vector<64x512xf32>
    %65 = arith.addf %56, %64 : vector<64x512xf32>
    %c496_i32 = arith.constant 496 : i32
    %66 = tpu.dynamic_rotate %5 by %c496_i32 dim 1 : vector<8x512xf32>, i32 -> vector<8x512xf32>
    %67 = vector.extract_strided_slice %1 {offsets = [7, 0], sizes = [1, 512], strides = [1, 1]} : vector<9x512xf32> to vector<1x512xf32>
    %68 = vector.broadcast %67 : vector<1x512xf32> to vector<8x512xf32>
    %69 = arith.mulf %66, %68 : vector<8x512xf32>
    %70 = vector.extract_strided_slice %2 {offsets = [7, 0, 0], sizes = [1, 64, 8], strides = [1, 1, 1]} : vector<9x64x8xbf16> to vector<1x64x8xbf16>
    %71 = vector.shape_cast %70 : vector<1x64x8xbf16> to vector<64x8xbf16>
    %72 = arith.truncf %69 : vector<8x512xf32> to vector<8x512xbf16>
    %cst_17 = arith.constant dense<0.000000e+00> : vector<64x512xf32>
    %73 = tpu.matmul %71, %72, %cst_17 {dimension_numbers = #tpu.dot_dimension_numbers<[1], [0], [0], [1], [0, 0, 1, 1], [], []>} : vector<64x8xbf16>, vector<8x512xbf16>, vector<64x512xf32> -> vector<64x512xf32>
    %74 = arith.addf %65, %73 : vector<64x512xf32>
    %c495_i32 = arith.constant 495 : i32
    %75 = tpu.dynamic_rotate %5 by %c495_i32 dim 1 : vector<8x512xf32>, i32 -> vector<8x512xf32>
    %76 = vector.extract_strided_slice %1 {offsets = [8, 0], sizes = [1, 512], strides = [1, 1]} : vector<9x512xf32> to vector<1x512xf32>
    %77 = vector.broadcast %76 : vector<1x512xf32> to vector<8x512xf32>
    %78 = arith.mulf %75, %77 : vector<8x512xf32>
    %79 = vector.extract_strided_slice %2 {offsets = [8, 0, 0], sizes = [1, 64, 8], strides = [1, 1, 1]} : vector<9x64x8xbf16> to vector<1x64x8xbf16>
    %80 = vector.shape_cast %79 : vector<1x64x8xbf16> to vector<64x8xbf16>
    %81 = arith.truncf %78 : vector<8x512xf32> to vector<8x512xbf16>
    %cst_18 = arith.constant dense<0.000000e+00> : vector<64x512xf32>
    %82 = tpu.matmul %80, %81, %cst_18 {dimension_numbers = #tpu.dot_dimension_numbers<[1], [0], [0], [1], [0, 0, 1, 1], [], []>} : vector<64x8xbf16>, vector<8x512xbf16>, vector<64x512xf32> -> vector<64x512xf32>
    %83 = arith.addf %74, %82 : vector<64x512xf32>
    %84 = vector.extract_strided_slice %83 {offsets = [0, 0], sizes = [32, 512], strides = [1, 1]} : vector<64x512xf32> to vector<32x512xf32>
    %c0_19 = arith.constant 0 : index
    %c0_20 = arith.constant 0 : index
    %85 = vector.load %arg4[%c0_19, %c0_20] : memref<32x1xf32, #tpu.memory_space<vmem>>, vector<32x1xf32>
    %86 = vector.broadcast %85 : vector<32x1xf32> to vector<32x512xf32>
    %87 = arith.addf %84, %86 : vector<32x512xf32>
    %cst_21 = arith.constant 0.000000e+00 : f32
    %88 = vector.broadcast %cst_21 : f32 to vector<32x512xf32>
    %89 = arith.maximumf %87, %88 : vector<32x512xf32>
    %cst_22 = arith.constant 0.000000e+00 : f32
    %90 = vector.broadcast %cst_22 : f32 to vector<32x512xf32>
    %c17_i32_23 = arith.constant 17 : i32
    %91 = tpu.dynamic_rotate %89 by %c17_i32_23 dim 1 : vector<32x512xf32>, i32 -> vector<32x512xf32>
    %92 = vector.extract_strided_slice %1 {offsets = [0, 0], sizes = [1, 512], strides = [1, 1]} : vector<9x512xf32> to vector<1x512xf32>
    %93 = vector.broadcast %92 : vector<1x512xf32> to vector<32x512xf32>
    %94 = arith.mulf %91, %93 : vector<32x512xf32>
    %95 = vector.extract_strided_slice %3 {offsets = [0, 0, 0], sizes = [1, 32, 32], strides = [1, 1, 1]} : vector<9x32x32xbf16> to vector<1x32x32xbf16>
    %96 = vector.shape_cast %95 : vector<1x32x32xbf16> to vector<32x32xbf16>
    %97 = arith.truncf %94 : vector<32x512xf32> to vector<32x512xbf16>
    %cst_24 = arith.constant dense<0.000000e+00> : vector<32x512xf32>
    %98 = tpu.matmul %96, %97, %cst_24 {dimension_numbers = #tpu.dot_dimension_numbers<[1], [0], [0], [1], [0, 0, 1, 1], [], []>} : vector<32x32xbf16>, vector<32x512xbf16>, vector<32x512xf32> -> vector<32x512xf32>
    %99 = arith.addf %90, %98 : vector<32x512xf32>
    %c16_i32_25 = arith.constant 16 : i32
    %100 = tpu.dynamic_rotate %89 by %c16_i32_25 dim 1 : vector<32x512xf32>, i32 -> vector<32x512xf32>
    %101 = vector.extract_strided_slice %1 {offsets = [1, 0], sizes = [1, 512], strides = [1, 1]} : vector<9x512xf32> to vector<1x512xf32>
    %102 = vector.broadcast %101 : vector<1x512xf32> to vector<32x512xf32>
    %103 = arith.mulf %100, %102 : vector<32x512xf32>
    %104 = vector.extract_strided_slice %3 {offsets = [1, 0, 0], sizes = [1, 32, 32], strides = [1, 1, 1]} : vector<9x32x32xbf16> to vector<1x32x32xbf16>
    %105 = vector.shape_cast %104 : vector<1x32x32xbf16> to vector<32x32xbf16>
    %106 = arith.truncf %103 : vector<32x512xf32> to vector<32x512xbf16>
    %cst_26 = arith.constant dense<0.000000e+00> : vector<32x512xf32>
    %107 = tpu.matmul %105, %106, %cst_26 {dimension_numbers = #tpu.dot_dimension_numbers<[1], [0], [0], [1], [0, 0, 1, 1], [], []>} : vector<32x32xbf16>, vector<32x512xbf16>, vector<32x512xf32> -> vector<32x512xf32>
    %108 = arith.addf %99, %107 : vector<32x512xf32>
    %c15_i32_27 = arith.constant 15 : i32
    %109 = tpu.dynamic_rotate %89 by %c15_i32_27 dim 1 : vector<32x512xf32>, i32 -> vector<32x512xf32>
    %110 = vector.extract_strided_slice %1 {offsets = [2, 0], sizes = [1, 512], strides = [1, 1]} : vector<9x512xf32> to vector<1x512xf32>
    %111 = vector.broadcast %110 : vector<1x512xf32> to vector<32x512xf32>
    %112 = arith.mulf %109, %111 : vector<32x512xf32>
    %113 = vector.extract_strided_slice %3 {offsets = [2, 0, 0], sizes = [1, 32, 32], strides = [1, 1, 1]} : vector<9x32x32xbf16> to vector<1x32x32xbf16>
    %114 = vector.shape_cast %113 : vector<1x32x32xbf16> to vector<32x32xbf16>
    %115 = arith.truncf %112 : vector<32x512xf32> to vector<32x512xbf16>
    %cst_28 = arith.constant dense<0.000000e+00> : vector<32x512xf32>
    %116 = tpu.matmul %114, %115, %cst_28 {dimension_numbers = #tpu.dot_dimension_numbers<[1], [0], [0], [1], [0, 0, 1, 1], [], []>} : vector<32x32xbf16>, vector<32x512xbf16>, vector<32x512xf32> -> vector<32x512xf32>
    %117 = arith.addf %108, %116 : vector<32x512xf32>
    %c1_i32_29 = arith.constant 1 : i32
    %118 = tpu.dynamic_rotate %89 by %c1_i32_29 dim 1 : vector<32x512xf32>, i32 -> vector<32x512xf32>
    %119 = vector.extract_strided_slice %1 {offsets = [3, 0], sizes = [1, 512], strides = [1, 1]} : vector<9x512xf32> to vector<1x512xf32>
    %120 = vector.broadcast %119 : vector<1x512xf32> to vector<32x512xf32>
    %121 = arith.mulf %118, %120 : vector<32x512xf32>
    %122 = vector.extract_strided_slice %3 {offsets = [3, 0, 0], sizes = [1, 32, 32], strides = [1, 1, 1]} : vector<9x32x32xbf16> to vector<1x32x32xbf16>
    %123 = vector.shape_cast %122 : vector<1x32x32xbf16> to vector<32x32xbf16>
    %124 = arith.truncf %121 : vector<32x512xf32> to vector<32x512xbf16>
    %cst_30 = arith.constant dense<0.000000e+00> : vector<32x512xf32>
    %125 = tpu.matmul %123, %124, %cst_30 {dimension_numbers = #tpu.dot_dimension_numbers<[1], [0], [0], [1], [0, 0, 1, 1], [], []>} : vector<32x32xbf16>, vector<32x512xbf16>, vector<32x512xf32> -> vector<32x512xf32>
    %126 = arith.addf %117, %125 : vector<32x512xf32>
    %127 = vector.extract_strided_slice %3 {offsets = [4, 0, 0], sizes = [1, 32, 32], strides = [1, 1, 1]} : vector<9x32x32xbf16> to vector<1x32x32xbf16>
    %128 = vector.shape_cast %127 : vector<1x32x32xbf16> to vector<32x32xbf16>
    %129 = arith.truncf %89 : vector<32x512xf32> to vector<32x512xbf16>
    %cst_31 = arith.constant dense<0.000000e+00> : vector<32x512xf32>
    %130 = tpu.matmul %128, %129, %cst_31 {dimension_numbers = #tpu.dot_dimension_numbers<[1], [0], [0], [1], [0, 0, 1, 1], [], []>} : vector<32x32xbf16>, vector<32x512xbf16>, vector<32x512xf32> -> vector<32x512xf32>
    %131 = arith.addf %126, %130 : vector<32x512xf32>
    %c511_i32_32 = arith.constant 511 : i32
    %132 = tpu.dynamic_rotate %89 by %c511_i32_32 dim 1 : vector<32x512xf32>, i32 -> vector<32x512xf32>
    %133 = vector.extract_strided_slice %1 {offsets = [5, 0], sizes = [1, 512], strides = [1, 1]} : vector<9x512xf32> to vector<1x512xf32>
    %134 = vector.broadcast %133 : vector<1x512xf32> to vector<32x512xf32>
    %135 = arith.mulf %132, %134 : vector<32x512xf32>
    %136 = vector.extract_strided_slice %3 {offsets = [5, 0, 0], sizes = [1, 32, 32], strides = [1, 1, 1]} : vector<9x32x32xbf16> to vector<1x32x32xbf16>
    %137 = vector.shape_cast %136 : vector<1x32x32xbf16> to vector<32x32xbf16>
    %138 = arith.truncf %135 : vector<32x512xf32> to vector<32x512xbf16>
    %cst_33 = arith.constant dense<0.000000e+00> : vector<32x512xf32>
    %139 = tpu.matmul %137, %138, %cst_33 {dimension_numbers = #tpu.dot_dimension_numbers<[1], [0], [0], [1], [0, 0, 1, 1], [], []>} : vector<32x32xbf16>, vector<32x512xbf16>, vector<32x512xf32> -> vector<32x512xf32>
    %140 = arith.addf %131, %139 : vector<32x512xf32>
    %c497_i32_34 = arith.constant 497 : i32
    %141 = tpu.dynamic_rotate %89 by %c497_i32_34 dim 1 : vector<32x512xf32>, i32 -> vector<32x512xf32>
    %142 = vector.extract_strided_slice %1 {offsets = [6, 0], sizes = [1, 512], strides = [1, 1]} : vector<9x512xf32> to vector<1x512xf32>
    %143 = vector.broadcast %142 : vector<1x512xf32> to vector<32x512xf32>
    %144 = arith.mulf %141, %143 : vector<32x512xf32>
    %145 = vector.extract_strided_slice %3 {offsets = [6, 0, 0], sizes = [1, 32, 32], strides = [1, 1, 1]} : vector<9x32x32xbf16> to vector<1x32x32xbf16>
    %146 = vector.shape_cast %145 : vector<1x32x32xbf16> to vector<32x32xbf16>
    %147 = arith.truncf %144 : vector<32x512xf32> to vector<32x512xbf16>
    %cst_35 = arith.constant dense<0.000000e+00> : vector<32x512xf32>
    %148 = tpu.matmul %146, %147, %cst_35 {dimension_numbers = #tpu.dot_dimension_numbers<[1], [0], [0], [1], [0, 0, 1, 1], [], []>} : vector<32x32xbf16>, vector<32x512xbf16>, vector<32x512xf32> -> vector<32x512xf32>
    %149 = arith.addf %140, %148 : vector<32x512xf32>
    %c496_i32_36 = arith.constant 496 : i32
    %150 = tpu.dynamic_rotate %89 by %c496_i32_36 dim 1 : vector<32x512xf32>, i32 -> vector<32x512xf32>
    %151 = vector.extract_strided_slice %1 {offsets = [7, 0], sizes = [1, 512], strides = [1, 1]} : vector<9x512xf32> to vector<1x512xf32>
    %152 = vector.broadcast %151 : vector<1x512xf32> to vector<32x512xf32>
    %153 = arith.mulf %150, %152 : vector<32x512xf32>
    %154 = vector.extract_strided_slice %3 {offsets = [7, 0, 0], sizes = [1, 32, 32], strides = [1, 1, 1]} : vector<9x32x32xbf16> to vector<1x32x32xbf16>
    %155 = vector.shape_cast %154 : vector<1x32x32xbf16> to vector<32x32xbf16>
    %156 = arith.truncf %153 : vector<32x512xf32> to vector<32x512xbf16>
    %cst_37 = arith.constant dense<0.000000e+00> : vector<32x512xf32>
    %157 = tpu.matmul %155, %156, %cst_37 {dimension_numbers = #tpu.dot_dimension_numbers<[1], [0], [0], [1], [0, 0, 1, 1], [], []>} : vector<32x32xbf16>, vector<32x512xbf16>, vector<32x512xf32> -> vector<32x512xf32>
    %158 = arith.addf %149, %157 : vector<32x512xf32>
    %c495_i32_38 = arith.constant 495 : i32
    %159 = tpu.dynamic_rotate %89 by %c495_i32_38 dim 1 : vector<32x512xf32>, i32 -> vector<32x512xf32>
    %160 = vector.extract_strided_slice %1 {offsets = [8, 0], sizes = [1, 512], strides = [1, 1]} : vector<9x512xf32> to vector<1x512xf32>
    %161 = vector.broadcast %160 : vector<1x512xf32> to vector<32x512xf32>
    %162 = arith.mulf %159, %161 : vector<32x512xf32>
    %163 = vector.extract_strided_slice %3 {offsets = [8, 0, 0], sizes = [1, 32, 32], strides = [1, 1, 1]} : vector<9x32x32xbf16> to vector<1x32x32xbf16>
    %164 = vector.shape_cast %163 : vector<1x32x32xbf16> to vector<32x32xbf16>
    %165 = arith.truncf %162 : vector<32x512xf32> to vector<32x512xbf16>
    %cst_39 = arith.constant dense<0.000000e+00> : vector<32x512xf32>
    %166 = tpu.matmul %164, %165, %cst_39 {dimension_numbers = #tpu.dot_dimension_numbers<[1], [0], [0], [1], [0, 0, 1, 1], [], []>} : vector<32x32xbf16>, vector<32x512xbf16>, vector<32x512xf32> -> vector<32x512xf32>
    %167 = arith.addf %158, %166 : vector<32x512xf32>
    %c0_40 = arith.constant 0 : index
    %c0_41 = arith.constant 0 : index
    %168 = vector.load %arg6[%c0_40, %c0_41] : memref<32x1xf32, #tpu.memory_space<vmem>>, vector<32x1xf32>
    %169 = vector.broadcast %168 : vector<32x1xf32> to vector<32x512xf32>
    %170 = arith.addf %167, %169 : vector<32x512xf32>
    %171 = vector.extract_strided_slice %83 {offsets = [32, 0], sizes = [32, 512], strides = [1, 1]} : vector<64x512xf32> to vector<32x512xf32>
    %c0_42 = arith.constant 0 : index
    %c0_43 = arith.constant 0 : index
    %172 = vector.load %arg7[%c0_42, %c0_43] : memref<32x1xf32, #tpu.memory_space<vmem>>, vector<32x1xf32>
    %173 = vector.broadcast %172 : vector<32x1xf32> to vector<32x512xf32>
    %174 = arith.addf %171, %173 : vector<32x512xf32>
    %175 = arith.addf %174, %170 : vector<32x512xf32>
    %cst_44 = arith.constant 0.000000e+00 : f32
    %176 = vector.broadcast %cst_44 : f32 to vector<32x512xf32>
    %177 = arith.maximumf %175, %176 : vector<32x512xf32>
    %c0_45 = arith.constant 0 : index
    %c0_46 = arith.constant 0 : index
    %178 = vector.load %arg8[%c0_45, %c0_46] : memref<32x512xf32, #tpu.memory_space<vmem>>, vector<32x512xf32>
    tpu.vector_store %arg8[%c0_45, %c0_46], %177 {strides = array<i32>} : memref<32x512xf32, #tpu.memory_space<vmem>>, vector<32x512xf32>,
    return
  }
  func.func @transform_0(%arg0: i32) -> (i32, i32) {
    %c0_i32 = arith.constant 0 : i32
    %c0_i32_0 = arith.constant 0 : i32
    return %c0_i32, %arg0 : i32, i32
  }
  func.func @transform_1(%arg0: i32) -> (i32, i32) {
    %c0_i32 = arith.constant 0 : i32
    %c0_i32_0 = arith.constant 0 : i32
    %c0_i32_1 = arith.constant 0 : i32
    return %c0_i32, %c0_i32_0 : i32, i32
  }
  func.func @transform_2(%arg0: i32) -> (i32, i32, i32) {
    %c0_i32 = arith.constant 0 : i32
    %c0_i32_0 = arith.constant 0 : i32
    %c0_i32_1 = arith.constant 0 : i32
    %c0_i32_2 = arith.constant 0 : i32
    return %c0_i32, %c0_i32_0, %c0_i32_1 : i32, i32, i32
  }
  func.func @transform_3(%arg0: i32) -> (i32, i32) {
    %c0_i32 = arith.constant 0 : i32
    %c0_i32_0 = arith.constant 0 : i32
    %c0_i32_1 = arith.constant 0 : i32
    return %c0_i32, %c0_i32_0 : i32, i32
  }
  func.func @transform_4(%arg0: i32) -> (i32, i32, i32) {
    %c0_i32 = arith.constant 0 : i32
    %c0_i32_0 = arith.constant 0 : i32
    %c0_i32_1 = arith.constant 0 : i32
    %c0_i32_2 = arith.constant 0 : i32
    return %c0_i32, %c0_i32_0, %c0_i32_1 : i32, i32, i32
  }
  func.func @transform_5(%arg0: i32) -> (i32, i32) {
    %c0_i32 = arith.constant 0 : i32
    %c0_i32_0 = arith.constant 0 : i32
    %c0_i32_1 = arith.constant 0 : i32
    return %c0_i32, %c0_i32_0 : i32, i32
  }
  func.func @transform_6(%arg0: i32) -> (i32, i32) {
    %c0_i32 = arith.constant 0 : i32
    %c0_i32_0 = arith.constant 0 : i32
    %c0_i32_1 = arith.constant 0 : i32
    return %c0_i32, %c0_i32_0 : i32, i32
  }
  func.func @transform_7(%arg0: i32) -> (i32, i32) {
    %c0_i32 = arith.constant 0 : i32
    %c0_i32_0 = arith.constant 0 : i32
    return %c0_i32, %arg0 : i32, i32
  }
}

</mosaic_0001>

<bundles_post_ra>
// kernel: tpu_custom_call.1
= control target key start
LH: loop header
LB: loop body
LE: loop exit
PB: predicated region body
PF: predicated region fallthrough
CT: control target
= control target key end

     0   :  { %vm152_vm0 = vcmask 1043456   ;;  %s5103_s28 = smov 16   ;;  %v7039_v8 = vmov 0   ;;  %s5106_s29 = smov 15   ;;  %s7031_s0 = inlined_call_operand.vmem [shape: f32[4,512], index: 0, kind: input, shape index: {}]   ;;  %s7032_s1 = inlined_call_operand.vmem [shape: f32[9,512], index: 1, kind: input, shape index: {}]   ;;  %s7033_s2 = inlined_call_operand.vmem [shape: bf16[9,64,8], index: 2, kind: input, shape index: {}]   ;;  %s7034_s3 = inlined_call_operand.vmem [shape: f32[32,1], index: 3, kind: input, shape index: {}]   ;;  %s7035_s4 = inlined_call_operand.vmem [shape: bf16[9,32,32], index: 4, kind: input, shape index: {}]   ;;  %s7036_s5 = inlined_call_operand.vmem [shape: f32[32,1], index: 5, kind: input, shape index: {}]   ;;  %s7037_s6 = inlined_call_operand.vmem [shape: f32[32,1], index: 6, kind: input, shape index: {}]   ;;  %s7038_s7 = inlined_call_operand.hbm [shape: f32[32,512], index: 7, kind: output, shape index: {}]  }
   0x1   :  { %v29_v0 = vld [vmem:[%s7031_s0 + $0x8] sm:$0xff]  ;;  %v28_v1 = vld [vmem:[%s7031_s0] sm:$0xff]  ;;  %310 = vmatprep.mubr.bf16.mxu0 %v7039_v8  ;;  %383 = vmatprep.mubr.bf16.mxu1 %v7039_v8  ;;  %s5105_s0 = smov 17   ;;  %s5107_s30 = smov 1  }
   0x2   :  { %v5162_v2 = vsel %vm152_vm0, %v29_v0, 0.0  ;;  %v5165_v3 = vsel %vm152_vm0, %v28_v1, 0.0  ;;  %v149_v4 = vcombine.high %v29_v0, %v29_v0  ;;  %v148_v5 = vcombine.high %v28_v1, %v28_v1  ;;  %5018 = vset.pattern.permute.xlu1 %v7039_v8  ;;  %5017 = vset.pattern.permute.xlu0 %v7039_v8  ;;  %s5108_s8 = smov 127   ;;  %s5109_s9 = smov 113  }
   0x3   :  { %200 = vrot.lane.b32.xlu1 %v5162_v2, %s5103_s28  ;;  %196 = vrot.lane.b32.xlu0 %v5165_v3, %s5103_s28 }
   0x4   :  { %v5172_v6 = vsel %vm152_vm0, %v149_v4, 0.0  ;;  %v5175_v7 = vsel %vm152_vm0, %v148_v5, 0.0 }
   0x7   :  { %202 = vrot.lane.b32.xlu1 %v5172_v6, %s5103_s28  ;;  %198 = vrot.lane.b32.xlu0 %v5175_v7, %s5103_s28 }
   0xb   :  { %159 = vrot.lane.b32.xlu1 %v5175_v7, %s5105_s0  ;;  %157 = vrot.lane.b32.xlu0 %v5165_v3, %s5105_s0 }
   0xf   :  { %163 = vrot.lane.b32.xlu1 %v5172_v6, %s5105_s0  ;;  %161 = vrot.lane.b32.xlu0 %v5162_v2, %s5105_s0 }
  0x13   :  { %616 = vrot.lane.b32.xlu1 %v5175_v7, %s5106_s29  ;;  %614 = vrot.lane.b32.xlu0 %v5165_v3, %s5106_s29 }
  0x17   :  { %620 = vrot.lane.b32.xlu1 %v5172_v6, %s5106_s29  ;;  %618 = vrot.lane.b32.xlu0 %v5162_v2, %s5106_s29 }
  0x1b   :  { %875 = vrot.lane.b32.xlu1 %v5175_v7, %s5107_s30  ;;  %873 = vrot.lane.b32.xlu0 %v5165_v3, %s5107_s30 }
  0x1f   :  { %879 = vrot.lane.b32.xlu1 %v5172_v6, %s5107_s30  ;;  %877 = vrot.lane.b32.xlu0 %v5162_v2, %s5107_s30 }
  0x23   :  { %1360 = vrot.lane.b32.xlu1 %v5175_v7, %s5108_s8  ;;  %1358 = vrot.lane.b32.xlu0 %v5165_v3, %s5108_s8 }
  0x27   :  { %1364 = vrot.lane.b32.xlu1 %v5172_v6, %s5108_s8  ;;  %1362 = vrot.lane.b32.xlu0 %v5162_v2, %s5108_s8 }
  0x2b   :  { %1619 = vrot.lane.b32.xlu1 %v5175_v7, %s5109_s9  ;;  %1617 = vrot.lane.b32.xlu0 %v5165_v3, %s5109_s9 }
  0x2c   :  { %12 = vsyncpa [#allocation3], 0  ;;  %s5110_s10 = smov 112   ;;  %v165_v9 = vlaneseq  ;;  %s5111_s11 = smov 111   ;;  %v5248_v12 = vld [vmem:[%s7032_s1 + $0x8] sm:$0xff]  ;;  %v5254_v14 = vld [vmem:[%s7032_s1 + $0x18] sm:$0xff] }
  0x2d   :  { %v5259_v15 = vld [vmem:[%s7032_s1] sm:$0xff]  ;;  %v5264_v16 = vld [vmem:[%s7032_s1 + $0x10] sm:$0xff]  ;;  %vm253_vm3 = vcmask 64512   ;;  %v5022_v4 = vld [vmem:[%s7033_s2 + $0x28] sm:$0xff]   ;;  %vm2604_vm10 = vcmask 261120  }
  0x2e   :  { %v5237_v10 = vshrl.u32 %v165_v9, 7  ;;  %v5243_v11 = vand.u32 127, %v165_v9  ;;  %v5021_v48 = vld [vmem:[%s7033_s2 + $0x20] sm:$0xff]  }
  0x2f   :  { %1623 = vrot.lane.b32.xlu1 %v5172_v6, %s5109_s9  ;;  %1621 = vrot.lane.b32.xlu0 %v5162_v2, %s5109_s9 }
  0x30   :  { %v211_v13 = vsub.s32 1, %v5237_v10  ;;  %v174_v19 = vsub.s32 0, %v5237_v10  ;;  %vm204_vm1 = vcmp.lt.s32.totalorder %v5243_v11, 16  ;;  %vm167_vm2 = vcmp.lt.s32.totalorder %v5243_v11, 17 }
  0x31   :  { %v629_v44 = vsub.s32 2, %v5237_v10  ;;  %vm622_vm4 = vcmp.lt.s32.totalorder %v5243_v11, 15  ;;  %vm881_vm5 = vcmp.lt.s32.totalorder %v5243_v11, 1  ;;  %vm1366_vm6 = vcmp.lt.s32.totalorder %v5243_v11, 127 }
  0x32   :  { %v5269_v20 = vrot.slane %v5248_v12, %v211_v13  ;;  %v5272_v21 = vrot.slane %v5254_v14, %v211_v13  ;;  %v5275_v22 = vrot.slane %v5259_v15, %v211_v13  ;;  %v5278_v23 = vrot.slane %v5264_v16, %v211_v13 }
  0x33   :  { %1878 = vrot.lane.b32.xlu1 %v5175_v7, %s5110_s10  ;;  %1876 = vrot.lane.b32.xlu0 %v5165_v3, %s5110_s10  ;;  %v5282_v26 = vrot.slane %v5248_v12, %v174_v19  ;;  %v5299_v42 = vrot.slane %v5259_v15, %v174_v19  ;;  %v5302_v43 = vrot.slane %v5264_v16, %v174_v19  ;;  %vm1625_vm7 = vcmp.lt.s32.totalorder %v5243_v11, 113 }
  0x34   :  { %v5314_v49 = vrot.slane %v5254_v14, %v174_v19  ;;  %v5323_v56 = vrot.slane %v5248_v12, %v629_v44  ;;  %vm1884_vm8 = vcmp.lt.s32.totalorder %v5243_v11, 112  ;;  %vm2143_vm9 = vcmp.lt.s32.totalorder %v5243_v11, 111  ;;  %v5073_v11 = vld [vmem:[%s7035_s4 + $0x80] sm:$0xff]  }
  0x37   :  { %1882 = vrot.lane.b32.xlu1 %v5172_v6, %s5110_s10  ;;  %1880 = vrot.lane.b32.xlu0 %v5162_v2, %s5110_s10 }
  0x3b   :  { %2137 = vrot.lane.b32.xlu1 %v5175_v7, %s5111_s11  ;;  %2135 = vrot.lane.b32.xlu0 %v5165_v3, %s5111_s11 }
  0x3f   :  { %2141 = vrot.lane.b32.xlu1 %v5172_v6, %s5111_s11  ;;  %2139 = vrot.lane.b32.xlu0 %v5162_v2, %s5111_s11 }
  0x75   :  { %v201_v17 = vpop.permute.xlu1 %200  ;;  %v197_v18 = vpop.permute.xlu0 %196 }
  0x79   :  { %v203_v24 = vpop.permute.xlu1 %202  ;;  %v199_v25 = vpop.permute.xlu0 %198 }
  0x7a   :  { %v208_v27 = vsel %vm204_vm1, %v203_v24, %v197_v18  ;;  %v206_v28 = vsel %vm204_vm1, %v199_v25, %v201_v17  ;;  %v207_v29 = vsel %vm204_vm1, %v197_v18, %v199_v25  ;;  %v205_v30 = vsel %vm204_vm1, %v201_v17, %v203_v24 }
  0x7b   :  { %v226_v31 = vmul.f32 %v5269_v20, %v207_v29  ;;  %v228_v32 = vmul.f32 %v5272_v21, %v205_v30  ;;  %v225_v33 = vmul.f32 %v5275_v22, %v208_v27  ;;  %v227_v34 = vmul.f32 %v5278_v23, %v206_v28  ;;  %v5023_v29 = vld [vmem:[%s7033_s2 + $0x30] sm:$0xff]  }
  0x7c   :  { %v5344_v17 = vrot.slane %v5254_v14, %v629_v44 }
  0x7d   :  { %v230_v35 = vpack.c.bf16 %v226_v31, %v226_v31  ;;  %v232_v36 = vpack.c.bf16 %v228_v32, %v228_v32  ;;  %v229_v37 = vpack.c.bf16 %v225_v33, %v225_v33  ;;  %v231_v38 = vpack.c.bf16 %v227_v34, %v227_v34  ;;  %v160_v39 = vpop.permute.xlu1 %159  ;;  %v158_v40 = vpop.permute.xlu0 %157 }
  0x7e   :  { %v170_v41 = vsel %vm167_vm2, %v158_v40, %v160_v39  ;;  %v5363_v32 = vrot.slane %v5259_v15, %v629_v44  ;;  %v5366_v33 = vrot.slane %v5264_v16, %v629_v44  ;;  %v888_v34 = vsub.s32 3, %v5237_v10 }
  0x7f   :  { %4393 = vmatprep.subr.msk.bf16.mxu0 %vm152_vm0, %v230_v35  ;;  %4398 = vmatprep.subr.msk.bf16.mxu1 %vm152_vm0, %v232_v36  ;;  %v267_v45 = vsel %vm152_vm0, %v229_v37, 0  ;;  %v273_v46 = vsel %vm152_vm0, %v231_v38, 0  ;;  %v189_v47 = vmul.f32 %v5282_v26, %v170_v41  ;;  %v5024_v35 = vld [vmem:[%s7033_s2 + $0x38] sm:$0xff]  }
  0x80   :  { %279 = vmatpush1.bf16.msra.mxu0 %v267_v45  ;;  %352 = vmatpush1.bf16.msra.mxu1 %v273_v46  ;;  %v5380_v44 = vrot.slane %v5248_v12, %v888_v34  ;;  %v5383_v45 = vrot.slane %v5254_v14, %v888_v34 }
  0x81   :  { %v193_v50 = vpack.c.bf16 %v189_v47, %v189_v47  ;;  %v164_v51 = vpop.permute.xlu1 %163  ;;  %v162_v52 = vpop.permute.xlu0 %161 }
  0x82   :  { %v171_v53 = vsel %vm167_vm2, %v164_v51, %v158_v40  ;;  %v168_v54 = vsel %vm167_vm2, %v162_v52, %v164_v51  ;;  %v169_v55 = vsel %vm167_vm2, %v160_v39, %v162_v52  ;;  %7107 = vst [vmem:[#allocation5_spill] sm:$0xff] %v5380_v44  ;;  %7108 = vst [vmem:[#allocation6_spill] sm:$0xff] %v5383_v45 }
  0x83   :  { %4394 = vmatmul.mubr.msk.bf16.vlgmr.msra.gmra.mrb[0].mxu0 %vm253_vm3, %v5021_v48  ;;  %4399 = vmatmul.mubr.msk.bf16.vlgmr.msra.gmra.mrb[0].mxu1 %vm253_vm3, %v5021_v48  ;;  %v188_v57 = vmul.f32 %v5299_v42, %v171_v53  ;;  %v190_v58 = vmul.f32 %v5302_v43, %v169_v55  ;;  %v191_v59 = vmul.f32 %v5314_v49, %v168_v54  ;;  %v5025_v53 = vld [vmem:[%s7033_s2] sm:$0xff]  }
  0x84   :  { %320 = vmatprep.mubr.bf16.mxu0 %v7039_v8  ;;  %393 = vmatprep.mubr.bf16.mxu1 %v7039_v8 }
  0x85   :  { %v192_v60 = vpack.c.bf16 %v188_v57, %v188_v57  ;;  %v194_v61 = vpack.c.bf16 %v190_v58, %v190_v58  ;;  %v195_v62 = vpack.c.bf16 %v191_v59, %v191_v59  ;;  %4407 = vmatprep.subr.msk.bf16.mxu0 %vm152_vm0, %v193_v50  ;;  %v617_v63 = vpop.permute.xlu1 %616  ;;  %v615_v0 = vpop.permute.xlu0 %614  ;;  %v5026_v59 = vld [vmem:[%s7033_s2 + $0x8] sm:$0xff]  }
  0x86   :  { %v625_v1 = vsel %vm622_vm4, %v615_v0, %v617_v63 }
  0x87   :  { %4412 = vmatprep.subr.msk.bf16.mxu1 %vm152_vm0, %v195_v62  ;;  %v463_v5 = vsel %vm152_vm0, %v194_v61, 0  ;;  %v457_v9 = vsel %vm152_vm0, %v192_v60, 0  ;;  %v644_v13 = vmul.f32 %v5323_v56, %v625_v1  ;;  %v5027_v60 = vld [vmem:[%s7033_s2 + $0x10] sm:$0xff]   ;;  %v5421_v61 = vrot.slane %v5259_v15, %v888_v34 }
  0x88   :  { %542 = vmatpush1.bf16.msra.mxu1 %v463_v5  ;;  %469 = vmatpush1.bf16.msra.mxu0 %v457_v9  ;;  %v5424_v62 = vrot.slane %v5264_v16, %v888_v34 }
  0x89   :  { %v648_v18 = vpack.c.bf16 %v644_v13, %v644_v13  ;;  %v621_v19 = vpop.permute.xlu1 %620  ;;  %v619_v24 = vpop.permute.xlu0 %618  ;;  %7109 = vst [vmem:[#allocation7_spill] sm:$0xff] %v5421_v61 }
  0x8a   :  { %v623_v25 = vsel %vm622_vm4, %v619_v24, %v621_v19  ;;  %v626_v36 = vsel %vm622_vm4, %v621_v19, %v615_v0  ;;  %v624_v37 = vsel %vm622_vm4, %v617_v63, %v619_v24  ;;  %7110 = vst [vmem:[#allocation8_spill] sm:$0xff] %v5424_v62  ;;  %v5028_v63 = vld [vmem:[%s7033_s2 + $0x18] sm:$0xff]  }
  0x8b   :  { %4395 = vmatmul.mubr.msk.bf16.gmra.mrb[4].mxu0 %vm253_vm3, %v5022_v4  ;;  %4400 = vmatmul.mubr.msk.bf16.gmra.mrb[4].mxu1 %vm253_vm3, %v5022_v4  ;;  %v646_v27 = vmul.f32 %v5344_v17, %v623_v25  ;;  %v643_v40 = vmul.f32 %v5363_v32, %v626_v36  ;;  %v645_v41 = vmul.f32 %v5366_v33, %v624_v37 }
  0x8c   :  { %330 = vmatprep.mubr.bf16.mxu0 %v7039_v8  ;;  %403 = vmatprep.mubr.bf16.mxu1 %v7039_v8  ;;  %v1133_v25 = vpack.c.bf16 %v5175_v7, %v5175_v7  ;;  %v5030_v7 = vld [vmem:[%s7033_s2 + $0x48] sm:$0xff]  }
  0x8d   :  { %v650_v28 = vpack.c.bf16 %v646_v27, %v646_v27  ;;  %4421 = vmatprep.subr.msk.bf16.mxu0 %vm152_vm0, %v648_v18  ;;  %v876_v30 = vpop.permute.xlu1 %875  ;;  %v874_v31 = vpop.permute.xlu0 %873  ;;  %v647_v48 = vpack.c.bf16 %v643_v40, %v643_v40  ;;  %v649_v50 = vpack.c.bf16 %v645_v41, %v645_v41  ;;  %v5029_v18 = vld [vmem:[%s7033_s2 + $0x40] sm:$0xff]   ;;  %v1135_v27 = vpack.c.bf16 %v5172_v6, %v5172_v6  ;;  %v5031_v6 = vld [vmem:[%s7033_s2 + $0x50] sm:$0xff]  }
  0x8e   :  { %v884_v46 = vsel %vm881_vm5, %v874_v31, %v876_v30  ;;  %v1132_v40 = vpack.c.bf16 %v5165_v3, %v5165_v3  ;;  %v1134_v41 = vpack.c.bf16 %v5162_v2, %v5162_v2  ;;  %v5034_v2 = vld [vmem:[%s7033_s2 + $0x68] sm:$0xff]   ;;  %v5035_v3 = vld [vmem:[%s7033_s2 + $0x70] sm:$0xff]  }
  0x8f   :  { %4426 = vmatprep.subr.msk.bf16.mxu1 %vm152_vm0, %v650_v28  ;;  %v903_v51 = vmul.f32 %v5380_v44, %v884_v46  ;;  %v690_v54 = vsel %vm152_vm0, %v649_v50, 0  ;;  %v684_v55 = vsel %vm152_vm0, %v647_v48, 0  ;;  %v5033_v48 = vld [vmem:[%s7033_s2 + $0x60] sm:$0xff]  }
  0x90   :  { %v1169_v50 = vsel %vm152_vm0, %v1132_v40, 0  ;;  %v2396_v40 = vld [vmem:[%s7034_s3 + $0x10] sm:$0xff] }
  0x91   :  { %v880_v38 = vpop.permute.xlu1 %879  ;;  %v878_v39 = vpop.permute.xlu0 %877  ;;  %v907_v57 = vpack.c.bf16 %v903_v51, %v903_v51  ;;  %v1175_v51 = vsel %vm152_vm0, %v1134_v41, 0  ;;  %v2397_v41 = vld [vmem:[%s7034_s3 + $0x18] sm:$0xff] }
  0x92   :  { %v882_v47 = vsel %vm881_vm5, %v878_v39, %v880_v38  ;;  %v885_v0 = vsel %vm881_vm5, %v880_v38, %v874_v31  ;;  %v883_v1 = vsel %vm881_vm5, %v876_v30, %v878_v39  ;;  %v1373_v30 = vsub.s32 5, %v5237_v10  ;;  %v5032_v31 = vld [vmem:[%s7033_s2 + $0x58] sm:$0xff]  }
  0x93   :  { %4396 = vmatmul.mubr.msk.bf16.gmra.mrb[8].mxu0 %vm253_vm3, %v5023_v29  ;;  %4401 = vmatmul.mubr.msk.bf16.gmra.mrb[8].mxu1 %vm253_vm3, %v5023_v29  ;;  %v905_v52 = vmul.f32 %v5383_v45, %v882_v47  ;;  %v902_v4 = vmul.f32 %v5421_v61, %v885_v0  ;;  %v904_v5 = vmul.f32 %v5424_v62, %v883_v1 }
  0x94   :  { %340 = vmatprep.mubr.bf16.mxu0 %v7039_v8  ;;  %413 = vmatprep.mubr.bf16.mxu1 %v7039_v8  ;;  %v5474_v36 = vrot.slane %v5254_v14, %v1373_v30  ;;  %v5477_v37 = vrot.slane %v5248_v12, %v1373_v30 }
  0x95   :  { %v909_v58 = vpack.c.bf16 %v905_v52, %v905_v52  ;;  %v906_v9 = vpack.c.bf16 %v902_v4, %v902_v4  ;;  %v908_v13 = vpack.c.bf16 %v904_v5, %v904_v5  ;;  %v1361_v28 = vpop.permute.xlu1 %1360  ;;  %v1359_v29 = vpop.permute.xlu0 %1358 }
  0x96   :  { %7111 = vst [vmem:[#allocation9_spill] sm:$0xff] %v5474_v36  ;;  %7112 = vst [vmem:[#allocation10_spill] sm:$0xff] %v5477_v37 }
  0x97   :  { %v949_v19 = vsel %vm152_vm0, %v908_v13, 0  ;;  %v943_v24 = vsel %vm152_vm0, %v906_v9, 0 }
  0x99   :  { %v1365_v34 = vpop.permute.xlu1 %1364 }
  0x9a   :  { %v1370_v38 = vsel %vm1366_vm6, %v1365_v34, %v1359_v29 }
  0x9b   :  { %4397 = vmatmul.mubr.msk.bf16.gmra.mrb[12].mxu0 %vm253_vm3, %v5024_v35  ;;  %4402 = vmatmul.mubr.msk.bf16.gmra.mrb[12].mxu1 %vm253_vm3, %v5024_v35  ;;  %v1363_v35 = vpop.permute.xlu0 %1362  ;;  %v1390_v46 = vmul.f32 %v5474_v36, %v1370_v38  ;;  %v2395_v38 = vld [vmem:[%s7034_s3 + $0x8] sm:$0xff] }
  0x9c   :  { %500 = vmatprep.mubr.bf16.mxu0 %v7039_v8  ;;  %573 = vmatprep.mubr.bf16.mxu1 %v7039_v8  ;;  %v1368_v39 = vsel %vm1366_vm6, %v1361_v28, %v1363_v35  ;;  %v1367_v0 = vsel %vm1366_vm6, %v1363_v35, %v1365_v34  ;;  %v5038_v35 = vld [vmem:[%s7033_s2 + $0x88] sm:$0xff]  }
  0x9d   :  { %v1388_v47 = vmul.f32 %v5477_v37, %v1368_v39  ;;  %v1394_v52 = vpack.c.bf16 %v1390_v46, %v1390_v46  ;;  %v2394_v39 = vld [vmem:[%s7034_s3] sm:$0xff]  ;;  %2405 = vperm.xlu1 %5018, %v2395_v38   ;;  %v5039_v46 = vld [vmem:[%s7033_s2 + $0x90] sm:$0xff]  }
  0x9e   :  { %2400 = vperm.xlu0 %5017, %v2394_v39  }
  0xa1   :  { %2410 = vperm.xlu1 %5018, %v2396_v40  }
  0xa2   :  { %2415 = vperm.xlu0 %5017, %v2397_v41  }
  0xa3   :  { %4408 = vmatmul.mubr.msk.bf16.vlgmr.msra.gmra.mrb[0].mxu0 %vm253_vm3, %v5025_v53  ;;  %4413 = vmatmul.mubr.msk.bf16.vlgmr.msra.gmra.mrb[0].mxu1 %vm253_vm3, %v5025_v53  ;;  %v1392_v53 = vpack.c.bf16 %v1388_v47, %v1388_v47 }
  0xa4   :  { %510 = vmatprep.mubr.bf16.mxu0 %v7039_v8  ;;  %583 = vmatprep.mubr.bf16.mxu1 %v7039_v8 }
  0xa5   :  { %769 = vmatpush1.bf16.msra.mxu1 %v690_v54  ;;  %696 = vmatpush1.bf16.msra.mxu0 %v684_v55  ;;  %v5514_v54 = vpop.permute.xlu1 %1619  ;;  %v5516_v55 = vpop.permute.xlu0 %1617 }
  0xa6   :  { %4435 = vmatprep.subr.msk.bf16.mxu0 %vm152_vm0, %v907_v57  ;;  %4440 = vmatprep.subr.msk.bf16.mxu1 %vm152_vm0, %v909_v58  ;;  %v5523_v57 = vrot.slane %v5259_v15, %v1373_v30  ;;  %v5526_v58 = vrot.slane %v5264_v16, %v1373_v30 }
  0xa8   :  { %7113 = vst [vmem:[#allocation11_spill] sm:$0xff] %v5523_v57  ;;  %7114 = vst [vmem:[#allocation12_spill] sm:$0xff] %v5526_v58  ;;  %v1389_v9 = vmul.f32 %v5526_v58, %v1367_v0 }
  0xa9   :  { %v1624_v1 = vpop.permute.xlu1 %1623  ;;  %v1622_v4 = vpop.permute.xlu0 %1621 }
  0xab   :  { %4409 = vmatmul.mubr.msk.bf16.gmra.mrb[4].mxu0 %vm253_vm3, %v5026_v59  ;;  %4414 = vmatmul.mubr.msk.bf16.gmra.mrb[4].mxu1 %vm253_vm3, %v5026_v59  ;;  %v1632_v59 = vsub.s32 6, %v5237_v10 }
  0xac   :  { %520 = vmatprep.mubr.bf16.mxu0 %v7039_v8  ;;  %593 = vmatprep.mubr.bf16.mxu1 %v7039_v8 }
  0xad   :  { %v5540_v13 = vrot.slane %v5254_v14, %v1632_v59  ;;  %v1879_v47 = vpop.permute.xlu1 %1878 }
  0xaf   :  { %7115 = vst [vmem:[#allocation13_spill] sm:$0xff] %v5540_v13 }
  0xb3   :  { %4410 = vmatmul.mubr.msk.bf16.gmra.mrb[8].mxu0 %vm253_vm3, %v5027_v60  ;;  %4415 = vmatmul.mubr.msk.bf16.gmra.mrb[8].mxu1 %vm253_vm3, %v5027_v60  ;;  %v5036_v60 = vld [vmem:[%s7033_s2 + $0x78] sm:$0xff]  }
  0xb4   :  { %530 = vmatprep.mubr.bf16.mxu0 %v7039_v8  ;;  %603 = vmatprep.mubr.bf16.mxu1 %v7039_v8 }
  0xbb   :  { %4411 = vmatmul.mubr.msk.bf16.gmra.mrb[12].mxu0 %vm253_vm3, %v5028_v63  ;;  %4416 = vmatmul.mubr.msk.bf16.gmra.mrb[12].mxu1 %vm253_vm3, %v5028_v63  ;;  %v1369_v63 = vsel %vm1366_vm6, %v1359_v29, %v1361_v28  ;;  %v5037_v28 = vld [vmem:[%s7033_s2 + $0x80] sm:$0xff]  }
  0xbc   :  { %727 = vmatprep.mubr.bf16.mxu0 %v7039_v8  ;;  %800 = vmatprep.mubr.bf16.mxu1 %v7039_v8  ;;  %v1387_v5 = vmul.f32 %v5523_v57, %v1369_v63 }
  0xc3   :  { %4422 = vmatmul.mubr.msk.bf16.vlgmr.msra.gmra.mrb[0].mxu0 %vm253_vm3, %v5029_v18  ;;  %4427 = vmatmul.mubr.msk.bf16.vlgmr.msra.gmra.mrb[0].mxu1 %vm253_vm3, %v5029_v18  ;;  %v5543_v18 = vrot.slane %v5248_v12, %v1632_v59 }
  0xc4   :  { %737 = vmatprep.mubr.bf16.mxu0 %v7039_v8  ;;  %810 = vmatprep.mubr.bf16.mxu1 %v7039_v8 }
  0xc5   :  { %1028 = vmatpush1.bf16.msra.mxu1 %v949_v19  ;;  %955 = vmatpush1.bf16.msra.mxu0 %v943_v24  ;;  %7116 = vst [vmem:[#allocation14_spill] sm:$0xff] %v5543_v18  ;;  %v1629_v19 = vsel %vm1625_vm7, %v1624_v1, %v5516_v55  ;;  %v1627_v24 = vsel %vm1625_vm7, %v5514_v54, %v1622_v4 }
  0xc6   :  { %4449 = vmatprep.subr.msk.bf16.mxu0 %vm152_vm0, %v1133_v25  ;;  %4454 = vmatprep.subr.msk.bf16.mxu1 %vm152_vm0, %v1135_v27  ;;  %v1391_v25 = vpack.c.bf16 %v1387_v5, %v1387_v5  ;;  %v1393_v27 = vpack.c.bf16 %v1389_v9, %v1389_v9  ;;  %v5041_v9 = vld [vmem:[%s7033_s2 + $0xa0] sm:$0xff]  }
  0xc8   :  { %v1428_v29 = vsel %vm152_vm0, %v1391_v25, 0  ;;  %v1434_v30 = vsel %vm152_vm0, %v1393_v27, 0 }
  0xcb   :  { %4423 = vmatmul.mubr.msk.bf16.gmra.mrb[4].mxu0 %vm253_vm3, %v5030_v7  ;;  %4428 = vmatmul.mubr.msk.bf16.gmra.mrb[4].mxu1 %vm253_vm3, %v5030_v7  ;;  %v1649_v7 = vmul.f32 %v5540_v13, %v1629_v19 }
  0xcc   :  { %747 = vmatprep.mubr.bf16.mxu0 %v7039_v8  ;;  %820 = vmatprep.mubr.bf16.mxu1 %v7039_v8 }
  0xd3   :  { %4424 = vmatmul.mubr.msk.bf16.gmra.mrb[8].mxu0 %vm253_vm3, %v5031_v6  ;;  %4429 = vmatmul.mubr.msk.bf16.gmra.mrb[8].mxu1 %vm253_vm3, %v5031_v6  ;;  %v1647_v6 = vmul.f32 %v5543_v18, %v1627_v24 }
  0xd4   :  { %757 = vmatprep.mubr.bf16.mxu0 %v7039_v8  ;;  %830 = vmatprep.mubr.bf16.mxu1 %v7039_v8 }
  0xd5   :  { %v1651_v34 = vpack.c.bf16 %v1647_v6, %v1647_v6  ;;  %v5043_v6 = vld [vmem:[%s7033_s2 + $0xb0] sm:$0xff]  }
  0xdb   :  { %4425 = vmatmul.mubr.msk.bf16.gmra.mrb[12].mxu0 %vm253_vm3, %v5032_v31  ;;  %4430 = vmatmul.mubr.msk.bf16.gmra.mrb[12].mxu1 %vm253_vm3, %v5032_v31  ;;  %v1653_v31 = vpack.c.bf16 %v1649_v7, %v1649_v7  ;;  %v5042_v7 = vld [vmem:[%s7033_s2 + $0xa8] sm:$0xff]  }
  0xdc   :  { %986 = vmatprep.mubr.bf16.mxu0 %v7039_v8  ;;  %1059 = vmatprep.mubr.bf16.mxu1 %v7039_v8 }
  0xe3   :  { %4436 = vmatmul.mubr.msk.bf16.vlgmr.msra.gmra.mrb[0].mxu0 %vm253_vm3, %v5033_v48  ;;  %4441 = vmatmul.mubr.msk.bf16.vlgmr.msra.gmra.mrb[0].mxu1 %vm253_vm3, %v5033_v48  ;;  %v1877_v48 = vpop.permute.xlu0 %1876 }
  0xe4   :  { %996 = vmatprep.mubr.bf16.mxu0 %v7039_v8  ;;  %1069 = vmatprep.mubr.bf16.mxu1 %v7039_v8 }
  0xe5   :  { %1181 = vmatpush1.bf16.msra.mxu0 %v1169_v50  ;;  %1254 = vmatpush1.bf16.msra.mxu1 %v1175_v51  ;;  %v5595_v50 = vrot.slane %v5259_v15, %v1632_v59  ;;  %v5598_v51 = vrot.slane %v5264_v16, %v1632_v59 }
  0xe6   :  { %4463 = vmatprep.subr.msk.bf16.mxu0 %vm152_vm0, %v1392_v53  ;;  %4468 = vmatprep.subr.msk.bf16.mxu1 %vm152_vm0, %v1394_v52  ;;  %v1891_v52 = vsub.s32 7, %v5237_v10  ;;  %v5040_v53 = vld [vmem:[%s7033_s2 + $0x98] sm:$0xff]  }
  0xe7   :  { %7117 = vst [vmem:[#allocation15_spill] sm:$0xff] %v5595_v50  ;;  %7118 = vst [vmem:[#allocation16_spill] sm:$0xff] %v5598_v51  ;;  %v1881_v63 = vpop.permute.xlu0 %1880 }
  0xe8   :  { %v5614_v0 = vrot.slane %v5254_v14, %v1891_v52  ;;  %v5617_v5 = vrot.slane %v5248_v12, %v1891_v52 }
  0xea   :  { %7119 = vst [vmem:[#allocation17_spill] sm:$0xff] %v5614_v0  ;;  %7120 = vst [vmem:[#allocation18_spill] sm:$0xff] %v5617_v5 }
  0xeb   :  { %4437 = vmatmul.mubr.msk.bf16.gmra.mrb[4].mxu0 %vm253_vm3, %v5034_v2  ;;  %4442 = vmatmul.mubr.msk.bf16.gmra.mrb[4].mxu1 %vm253_vm3, %v5034_v2  ;;  %v1628_v2 = vsel %vm1625_vm7, %v5516_v55, %v5514_v54  ;;  %v1886_v55 = vsel %vm1884_vm8, %v1879_v47, %v1881_v63 }
  0xec   :  { %1006 = vmatprep.mubr.bf16.mxu0 %v7039_v8  ;;  %1079 = vmatprep.mubr.bf16.mxu1 %v7039_v8  ;;  %v1646_v59 = vmul.f32 %v5595_v50, %v1628_v2  ;;  %v1906_v12 = vmul.f32 %v5617_v5, %v1886_v55  ;;  %v5046_v55 = vld [vmem:[%s7033_s2 + $0xc8] sm:$0xff]  }
  0xee   :  { %v1910_v27 = vpack.c.bf16 %v1906_v12, %v1906_v12 }
  0xf3   :  { %4438 = vmatmul.mubr.msk.bf16.gmra.mrb[8].mxu0 %vm253_vm3, %v5035_v3  ;;  %4443 = vmatmul.mubr.msk.bf16.gmra.mrb[8].mxu1 %vm253_vm3, %v5035_v3  ;;  %v1626_v3 = vsel %vm1625_vm7, %v1622_v4, %v1624_v1  ;;  %v1650_v1 = vpack.c.bf16 %v1646_v59, %v1646_v59 }
  0xf4   :  { %1016 = vmatprep.mubr.bf16.mxu0 %v7039_v8  ;;  %1089 = vmatprep.mubr.bf16.mxu1 %v7039_v8  ;;  %v1648_v10 = vmul.f32 %v5598_v51, %v1626_v3 }
  0xf5   :  { %v1687_v19 = vsel %vm152_vm0, %v1650_v1, 0  ;;  %v5047_v1 = vld [vmem:[%s7033_s2 + $0xd0] sm:$0xff]  }
  0xf6   :  { %v1652_v14 = vpack.c.bf16 %v1648_v10, %v1648_v10 }
  0xf8   :  { %v1693_v24 = vsel %vm152_vm0, %v1652_v14, 0  ;;  %v5048_v14 = vld [vmem:[%s7033_s2 + $0xd8] sm:$0xff]  }
  0xfb   :  { %4439 = vmatmul.mubr.msk.bf16.gmra.mrb[12].mxu0 %vm253_vm3, %v5036_v60  ;;  %4444 = vmatmul.mubr.msk.bf16.gmra.mrb[12].mxu1 %vm253_vm3, %v5036_v60  ;;  %v1883_v60 = vpop.permute.xlu1 %1882 }
  0xfc   :  { %1212 = vmatprep.mubr.bf16.mxu0 %v7039_v8  ;;  %1285 = vmatprep.mubr.bf16.mxu1 %v7039_v8  ;;  %v1888_v54 = vsel %vm1884_vm8, %v1883_v60, %v1877_v48  ;;  %v1885_v38 = vsel %vm1884_vm8, %v1881_v63, %v1883_v60  ;;  %v5045_v60 = vld [vmem:[%s7033_s2 + $0xc0] sm:$0xff]  }
  0xfd   :  { %v1908_v4 = vmul.f32 %v5614_v0, %v1888_v54 }
  0xff   :  { %v1912_v25 = vpack.c.bf16 %v1908_v4, %v1908_v4  ;;  %v4501_v4 = vld [vmem:[%s7032_s1 + $0x20] ss:$0 sm:$0xff] }
 0x103   :  { %4450 = vmatmul.mubr.msk.bf16.vlgmr.msra.gmra.mrb[0].mxu0 %vm253_vm3, %v5037_v28  ;;  %4455 = vmatmul.mubr.msk.bf16.vlgmr.msra.gmra.mrb[0].mxu1 %vm253_vm3, %v5037_v28  ;;  %v2138_v28 = vpop.permute.xlu1 %2137 }
 0x104   :  { %1222 = vmatprep.mubr.bf16.mxu0 %v7039_v8  ;;  %1295 = vmatprep.mubr.bf16.mxu1 %v7039_v8 }
 0x105   :  { %1440 = vmatpush1.bf16.msra.mxu0 %v1428_v29  ;;  %1513 = vmatpush1.bf16.msra.mxu1 %v1434_v30  ;;  %v2136_v29 = vpop.permute.xlu0 %2135  ;;  %v5655_v30 = vrot.slane %v5259_v15, %v1891_v52 }
 0x106   :  { %4477 = vmatprep.subr.msk.bf16.mxu0 %vm152_vm0, %v1651_v34  ;;  %4482 = vmatprep.subr.msk.bf16.mxu1 %vm152_vm0, %v1653_v31  ;;  %v5658_v31 = vrot.slane %v5264_v16, %v1891_v52  ;;  %v5044_v34 = vld [vmem:[%s7033_s2 + $0xb8] sm:$0xff]   ;;  %v2146_v12 = vsel %vm2143_vm9, %v2136_v29, %v2138_v28 }
 0x107   :  { %7121 = vst [vmem:[#allocation19_spill] sm:$0xff] %v5655_v30  ;;  %v2142_v39 = vpop.permute.xlu1 %2141  ;;  %v4504_v16 = vld [vmem:[%s7032_s1 + $0x38] ss:$0 sm:$0xff] }
 0x108   :  { %7122 = vst [vmem:[#allocation20_spill] sm:$0xff] %v5658_v31  ;;  %v1907_v41 = vmul.f32 %v5658_v31, %v1885_v38  ;;  %v5052_v38 = vld [vmem:[%s7033_s2 + $0xf8] sm:$0xff]  }
 0x109   :  { %v2140_v40 = vpop.permute.xlu0 %2139 }
 0x10b   :  { %4451 = vmatmul.mubr.msk.bf16.gmra.mrb[4].mxu0 %vm253_vm3, %v5038_v35  ;;  %4456 = vmatmul.mubr.msk.bf16.gmra.mrb[4].mxu1 %vm253_vm3, %v5038_v35  ;;  %v1887_v35 = vsel %vm1884_vm8, %v1877_v48, %v1879_v47  ;;  %v4502_v47 = vld [vmem:[%s7032_s1 + $0x28] ss:$0 sm:$0xff]  ;;  %v2145_v48 = vsel %vm2143_vm9, %v2138_v28, %v2140_v40 }
 0x10c   :  { %1232 = vmatprep.mubr.bf16.mxu0 %v7039_v8  ;;  %1305 = vmatprep.mubr.bf16.mxu1 %v7039_v8  ;;  %v1905_v15 = vmul.f32 %v5655_v30, %v1887_v35  ;;  %v2165_v3 = vmul.f32 %v4502_v47, %v2145_v48  ;;  %v5051_v35 = vld [vmem:[%s7033_s2 + $0xf0] sm:$0xff]  }
 0x10e   :  { %v1909_v52 = vpack.c.bf16 %v1905_v15, %v1905_v15  ;;  %v2169_v54 = vpack.c.bf16 %v2165_v3, %v2165_v3 }
 0x110   :  { %v1946_v63 = vsel %vm152_vm0, %v1909_v52, 0 }
 0x113   :  { %4452 = vmatmul.mubr.msk.bf16.gmra.mrb[8].mxu0 %vm253_vm3, %v5039_v46  ;;  %4457 = vmatmul.mubr.msk.bf16.gmra.mrb[8].mxu1 %vm253_vm3, %v5039_v46  ;;  %v2147_v46 = vsel %vm2143_vm9, %v2142_v39, %v2136_v29 }
 0x114   :  { %1242 = vmatprep.mubr.bf16.mxu0 %v7039_v8  ;;  %1315 = vmatprep.mubr.bf16.mxu1 %v7039_v8  ;;  %v2167_v2 = vmul.f32 %v4504_v16, %v2147_v46 }
 0x116   :  { %v2171_v10 = vpack.c.bf16 %v2167_v2, %v2167_v2 }
 0x11b   :  { %4453 = vmatmul.mubr.msk.bf16.gmra.mrb[12].mxu0 %vm253_vm3, %v5040_v53  ;;  %4458 = vmatmul.mubr.msk.bf16.gmra.mrb[12].mxu1 %vm253_vm3, %v5040_v53  ;;  %v1911_v53 = vpack.c.bf16 %v1907_v41, %v1907_v41 }
 0x11c   :  { %1471 = vmatprep.mubr.bf16.mxu0 %v7039_v8  ;;  %1544 = vmatprep.mubr.bf16.mxu1 %v7039_v8  ;;  %v2406_v15 = vpop.permute.xlu1 %2405 }
 0x11d   :  { %v1952_v59 = vsel %vm152_vm0, %v1911_v53, 0  ;;  %v2401_v41 = vpop.permute.xlu0 %2400 }
 0x123   :  { %4464 = vmatmul.mubr.msk.bf16.vlgmr.msra.gmra.mrb[0].mxu0 %vm253_vm3, %v5041_v9  ;;  %4469 = vmatmul.mubr.msk.bf16.vlgmr.msra.gmra.mrb[0].mxu1 %vm253_vm3, %v5041_v9  ;;  %v4503_v9 = vld [vmem:[%s7032_s1 + $0x30] ss:$0 sm:$0xff] }
 0x124   :  { %1481 = vmatprep.mubr.bf16.mxu0 %v7039_v8  ;;  %1554 = vmatprep.mubr.bf16.mxu1 %v7039_v8 }
 0x125   :  { %1699 = vmatpush1.bf16.msra.mxu0 %v1687_v19  ;;  %1772 = vmatpush1.bf16.msra.mxu1 %v1693_v24  ;;  %v2144_v19 = vsel %vm2143_vm9, %v2140_v40, %v2142_v39  ;;  %v2164_v24 = vmul.f32 %v4501_v4, %v2146_v12  ;;  %v5053_v39 = vld [vmem:[%s7033_s2 + $0x100] sm:$0xff]   ;;  %v5054_v40 = vld [vmem:[%s7033_s2 + $0x108] sm:$0xff]  }
 0x126   :  { %4491 = vmatprep.subr.msk.bf16.mxu0 %vm152_vm0, %v1910_v27  ;;  %4496 = vmatprep.subr.msk.bf16.mxu1 %vm152_vm0, %v1912_v25  ;;  %v2166_v25 = vmul.f32 %v4503_v9, %v2144_v19 }
 0x127   :  { %v2168_v27 = vpack.c.bf16 %v2164_v24, %v2164_v24 }
 0x129   :  { %v2205_v28 = vsel %vm152_vm0, %v2168_v27, 0 }
 0x12b   :  { %4465 = vmatmul.mubr.msk.bf16.gmra.mrb[4].mxu0 %vm253_vm3, %v5042_v7  ;;  %4470 = vmatmul.mubr.msk.bf16.gmra.mrb[4].mxu1 %vm253_vm3, %v5042_v7  ;;  %v2170_v7 = vpack.c.bf16 %v2166_v25, %v2166_v25 }
 0x12c   :  { %1491 = vmatprep.mubr.bf16.mxu0 %v7039_v8  ;;  %1564 = vmatprep.mubr.bf16.mxu1 %v7039_v8 }
 0x12d   :  { %v2211_v29 = vsel %vm152_vm0, %v2170_v7, 0 }
 0x133   :  { %4466 = vmatmul.mubr.msk.bf16.gmra.mrb[8].mxu0 %vm253_vm3, %v5043_v6  ;;  %4471 = vmatmul.mubr.msk.bf16.gmra.mrb[8].mxu1 %vm253_vm3, %v5043_v6  ;;  %v5049_v6 = vld [vmem:[%s7033_s2 + $0xe0] sm:$0xff]  }
 0x134   :  { %1501 = vmatprep.mubr.bf16.mxu0 %v7039_v8  ;;  %1574 = vmatprep.mubr.bf16.mxu1 %v7039_v8 }
 0x13b   :  { %4467 = vmatmul.mubr.msk.bf16.gmra.mrb[12].mxu0 %vm253_vm3, %v5044_v34  ;;  %4472 = vmatmul.mubr.msk.bf16.gmra.mrb[12].mxu1 %vm253_vm3, %v5044_v34  ;;  %v5050_v34 = vld [vmem:[%s7033_s2 + $0xe8] sm:$0xff]  }
 0x13c   :  { %1730 = vmatprep.mubr.bf16.mxu0 %v7039_v8  ;;  %1803 = vmatprep.mubr.bf16.mxu1 %v7039_v8 }
 0x143   :  { %4478 = vmatmul.mubr.msk.bf16.vlgmr.msra.gmra.mrb[0].mxu0 %vm253_vm3, %v5045_v60  ;;  %4483 = vmatmul.mubr.msk.bf16.vlgmr.msra.gmra.mrb[0].mxu1 %vm253_vm3, %v5045_v60 }
 0x144   :  { %1740 = vmatprep.mubr.bf16.mxu0 %v7039_v8  ;;  %1813 = vmatprep.mubr.bf16.mxu1 %v7039_v8 }
 0x145   :  { %1958 = vmatpush1.bf16.msra.mxu0 %v1946_v63  ;;  %2031 = vmatpush1.bf16.msra.mxu1 %v1952_v59 }
 0x146   :  { %4509 = vmatprep.subr.msk.bf16.mxu0 %vm152_vm0, %v2169_v54  ;;  %4514 = vmatprep.subr.msk.bf16.mxu1 %vm152_vm0, %v2171_v10 }
 0x14b   :  { %4479 = vmatmul.mubr.msk.bf16.gmra.mrb[4].mxu0 %vm253_vm3, %v5046_v55  ;;  %4484 = vmatmul.mubr.msk.bf16.gmra.mrb[4].mxu1 %vm253_vm3, %v5046_v55 }
 0x14c   :  { %1750 = vmatprep.mubr.bf16.mxu0 %v7039_v8  ;;  %1823 = vmatprep.mubr.bf16.mxu1 %v7039_v8 }
 0x153   :  { %4480 = vmatmul.mubr.msk.bf16.gmra.mrb[8].mxu0 %vm253_vm3, %v5047_v1  ;;  %4485 = vmatmul.mubr.msk.bf16.gmra.mrb[8].mxu1 %vm253_vm3, %v5047_v1 }
 0x154   :  { %1760 = vmatprep.mubr.bf16.mxu0 %v7039_v8  ;;  %1833 = vmatprep.mubr.bf16.mxu1 %v7039_v8 }
 0x15b   :  { %4481 = vmatmul.mubr.msk.bf16.gmra.mrb[12].mxu0 %vm253_vm3, %v5048_v14  ;;  %4486 = vmatmul.mubr.msk.bf16.gmra.mrb[12].mxu1 %vm253_vm3, %v5048_v14 }
 0x15c   :  { %1989 = vmatprep.mubr.bf16.mxu0 %v7039_v8  ;;  %2062 = vmatprep.mubr.bf16.mxu1 %v7039_v8 }
 0x163   :  { %4492 = vmatmul.mubr.msk.bf16.vlgmr.msra.gmra.mrb[0].mxu0 %vm253_vm3, %v5049_v6  ;;  %4497 = vmatmul.mubr.msk.bf16.vlgmr.msra.gmra.mrb[0].mxu1 %vm253_vm3, %v5049_v6 }
 0x164   :  { %1999 = vmatprep.mubr.bf16.mxu0 %v7039_v8  ;;  %2072 = vmatprep.mubr.bf16.mxu1 %v7039_v8 }
 0x165   :  { %2217 = vmatpush1.bf16.msra.mxu0 %v2205_v28  ;;  %2290 = vmatpush1.bf16.msra.mxu1 %v2211_v29 }
 0x16b   :  { %4493 = vmatmul.mubr.msk.bf16.gmra.mrb[4].mxu0 %vm253_vm3, %v5050_v34  ;;  %4498 = vmatmul.mubr.msk.bf16.gmra.mrb[4].mxu1 %vm253_vm3, %v5050_v34 }
 0x16c   :  { %2009 = vmatprep.mubr.bf16.mxu0 %v7039_v8  ;;  %2082 = vmatprep.mubr.bf16.mxu1 %v7039_v8 }
 0x173   :  { %4494 = vmatmul.mubr.msk.bf16.gmra.mrb[8].mxu0 %vm253_vm3, %v5051_v35  ;;  %4499 = vmatmul.mubr.msk.bf16.gmra.mrb[8].mxu1 %vm253_vm3, %v5051_v35 }
 0x174   :  { %2019 = vmatprep.mubr.bf16.mxu0 %v7039_v8  ;;  %2092 = vmatprep.mubr.bf16.mxu1 %v7039_v8 }
 0x17b   :  { %4495 = vmatmul.mubr.msk.bf16.gmra.mrb[12].mxu0 %vm253_vm3, %v5052_v38  ;;  %4500 = vmatmul.mubr.msk.bf16.gmra.mrb[12].mxu1 %vm253_vm3, %v5052_v38 }
 0x17c   :  { %2248 = vmatprep.mubr.bf16.mxu0 %v7039_v8  ;;  %2321 = vmatprep.mubr.bf16.mxu1 %v7039_v8 }
 0x183   :  { %4510 = vmatmul.mubr.msk.bf16.vlgmr.msra.gmra.mrb[0].mxu0 %vm253_vm3, %v5053_v39  ;;  %4515 = vmatmul.mubr.msk.bf16.vlgmr.msra.gmra.mrb[0].mxu1 %vm253_vm3, %v5053_v39 }
 0x184   :  { %2258 = vmatprep.mubr.bf16.mxu0 %v7039_v8  ;;  %2331 = vmatprep.mubr.bf16.mxu1 %v7039_v8 }
 0x18b   :  { %4511 = vmatmul.mubr.msk.bf16.gmra.mrb[4].mxu0 %vm253_vm3, %v5054_v40  ;;  %4516 = vmatmul.mubr.msk.bf16.gmra.mrb[4].mxu1 %vm253_vm3, %v5054_v40 }
 0x18c   :  { %2268 = vmatprep.mubr.bf16.mxu0 %v7039_v8  ;;  %2341 = vmatprep.mubr.bf16.mxu1 %v7039_v8 }
 0x256   :  { %v2250_v16 = vpop.f32.mrb[0].mxu0  ;;  %v2323_v46 = vpop.f32.mrb[0].mxu1 }
 0x257   :  { %v2418_v47 = vadd.f32 %v2401_v41, %v2250_v16  ;;  %v2252_v48 = vpop.f32.mrb[1].mxu0  ;;  %v2325_v52 = vpop.f32.mrb[1].mxu1  ;;  %v2420_v60 = vadd.f32 %v2401_v41, %v2323_v46 }
 0x258   :  { %v2327_v53 = vpop.f32.mrb[2].mxu1  ;;  %v2254_v2 = vpop.f32.mrb[2].mxu0  ;;  %v2419_v6 = vadd.f32 %v2401_v41, %v2252_v48  ;;  %v2421_v34 = vadd.f32 %v2401_v41, %v2325_v52 }
 0x259   :  { %v5770_v3 = vmax.f32 %v2418_v47, 0.0  ;;  %v2422_v63 = vadd.f32 %v2406_v15, %v2254_v2  ;;  %v2256_v59 = vpop.f32.mrb[3].mxu0  ;;  %v2329_v10 = vpop.f32.mrb[3].mxu1  ;;  %v2424_v54 = vadd.f32 %v2406_v15, %v2327_v53  ;;  %v5776_v1 = vmax.f32 %v2420_v60, 0.0 }
 0x25a   :  { %v2423_v28 = vadd.f32 %v2406_v15, %v2256_v59  ;;  %v5824_v29 = vmax.f32 %v2419_v6, 0.0  ;;  %v2425_v38 = vadd.f32 %v2406_v15, %v2329_v10  ;;  %v5832_v39 = vmax.f32 %v2421_v34, 0.0  ;;  %v2411_v15 = vpop.permute.xlu1 %2410  ;;  %v2416_v16 = vpop.permute.xlu0 %2415  ;;  %v5056_v59 = vld [vmem:[%s7033_s2 + $0x118] sm:$0xff]  }
 0x25b   :  { %7123 = vst [vmem:[#allocation21_spill] sm:$0xff] %v5770_v3  ;;  %v5772_v55 = vmax.f32 %v2422_v63, 0.0  ;;  %2522 = vrot.lane.b32.xlu1 %v5770_v3, %s5103_s28  ;;  %7125 = vst [vmem:[#allocation23_spill] sm:$0xff] %v5776_v1  ;;  %v5780_v12 = vmax.f32 %v2424_v54, 0.0  ;;  %v5055_v63 = vld [vmem:[%s7033_s2 + $0x110] sm:$0xff]  }
 0x25c   :  { %7127 = vst [vmem:[#allocation25_spill] sm:$0xff] %v5824_v29  ;;  %v5828_v35 = vmax.f32 %v2423_v28, 0.0  ;;  %7129 = vst [vmem:[#allocation27_spill] sm:$0xff] %v5832_v39  ;;  %v5836_v40 = vmax.f32 %v2425_v38, 0.0  ;;  %4512 = vmatmul.mubr.msk.bf16.gmra.mrb[8].mxu0 %vm253_vm3, %v5055_v63  ;;  %4517 = vmatmul.mubr.msk.bf16.gmra.mrb[8].mxu1 %vm253_vm3, %v5055_v63 }
 0x25d   :  { %7124 = vst [vmem:[#allocation22_spill] sm:$0xff] %v5772_v55  ;;  %2524 = vrot.lane.b32.xlu0 %v5772_v55, %s5103_s28  ;;  %7126 = vst [vmem:[#allocation24_spill] sm:$0xff] %v5780_v12  ;;  %2278 = vmatprep.mubr.bf16.mxu0 %v7039_v8 }
 0x25e   :  { %v2260_v14 = vpop.f32.mrb[4].mxu0  ;;  %v2333_v4 = vpop.f32.mrb[4].mxu1  ;;  %7128 = vst [vmem:[#allocation26_spill] sm:$0xff] %v5828_v35  ;;  %7130 = vst [vmem:[#allocation28_spill] sm:$0xff] %v5836_v40  ;;  %2351 = vmatprep.mubr.bf16.mxu1 %v7039_v8 }
 0x25f   :  { %v5782_v9 = vpop.f32.mrb[5].mxu1  ;;  %2538 = vrot.lane.b32.xlu1 %v5776_v1, %s5103_s28  ;;  %v5786_v19 = vpop.f32.mrb[5].mxu0  ;;  %v2426_v41 = vadd.f32 %v2411_v15, %v2260_v14  ;;  %v2428_v48 = vadd.f32 %v2411_v15, %v2333_v4 }
 0x260   :  { %v2264_v24 = vpop.f32.mrb[6].mxu0  ;;  %v2337_v25 = vpop.f32.mrb[6].mxu1  ;;  %v2427_v10 = vadd.f32 %v2411_v15, %v5786_v19  ;;  %v2429_v19 = vadd.f32 %v2411_v15, %v5782_v9 }
 0x261   :  { %v5788_v27 = vpop.f32.mrb[7].mxu1  ;;  %2540 = vrot.lane.b32.xlu0 %v5780_v12, %s5103_s28  ;;  %v5792_v7 = vpop.f32.mrb[7].mxu0  ;;  %v2430_v46 = vadd.f32 %v2416_v16, %v2264_v24  ;;  %v5872_v47 = vmax.f32 %v2426_v41, 0.0  ;;  %v2432_v53 = vadd.f32 %v2416_v16, %v2337_v25  ;;  %v5880_v2 = vmax.f32 %v2428_v48, 0.0 }
 0x262   :  { %v2431_v14 = vadd.f32 %v2416_v16, %v5792_v7  ;;  %v5941_v24 = vmax.f32 %v2427_v10, 0.0  ;;  %v2433_v6 = vadd.f32 %v2416_v16, %v5788_v27  ;;  %v5950_v34 = vmax.f32 %v2429_v19, 0.0 }
 0x263   :  { %2450 = vrot.lane.b32.xlu1 %v5770_v3, %s5105_s0  ;;  %7131 = vst [vmem:[#allocation29_spill] sm:$0xff] %v5872_v47  ;;  %v5876_v52 = vmax.f32 %v2430_v46, 0.0  ;;  %v5884_v60 = vmax.f32 %v2432_v53, 0.0 }
 0x264   :  { %4513 = vmatmul.mubr.msk.bf16.gmra.mrb[12].mxu0 %vm253_vm3, %v5056_v59  ;;  %4518 = vmatmul.mubr.msk.bf16.gmra.mrb[12].mxu1 %vm253_vm3, %v5056_v59  ;;  %v5946_v28 = vmax.f32 %v2431_v14, 0.0  ;;  %v5956_v9 = vmax.f32 %v2433_v6, 0.0 }
 0x265   :  { %2452 = vrot.lane.b32.xlu0 %v5772_v55, %s5105_s0  ;;  %2643 = vmatprep.mubr.bf16.mxu0 %v7039_v8 }
 0x266   :  { %2696 = vmatprep.mubr.bf16.mxu1 %v7039_v8 }
 0x267   :  { %2466 = vrot.lane.b32.xlu1 %v5776_v1, %s5105_s0 }
 0x269   :  { %2468 = vrot.lane.b32.xlu0 %v5780_v12, %s5105_s0 }
 0x26b   :  { %2839 = vrot.lane.b32.xlu1 %v5770_v3, %s5106_s29 }
 0x26d   :  { %2841 = vrot.lane.b32.xlu0 %v5772_v55, %s5106_s29 }
 0x26f   :  { %2855 = vrot.lane.b32.xlu1 %v5776_v1, %s5106_s29 }
 0x271   :  { %2857 = vrot.lane.b32.xlu0 %v5780_v12, %s5106_s29 }
 0x273   :  { %3049 = vrot.lane.b32.xlu1 %v5770_v3, %s5107_s30 }
 0x275   :  { %3051 = vrot.lane.b32.xlu0 %v5772_v55, %s5107_s30 }
 0x277   :  { %3065 = vrot.lane.b32.xlu1 %v5776_v1, %s5107_s30 }
 0x279   :  { %3067 = vrot.lane.b32.xlu0 %v5780_v12, %s5107_s30 }
 0x27b   :  { %3405 = vrot.lane.b32.xlu1 %v5770_v3, %s5108_s8 }
 0x27d   :  { %3407 = vrot.lane.b32.xlu0 %v5772_v55, %s5108_s8 }
 0x27f   :  { %3421 = vrot.lane.b32.xlu1 %v5776_v1, %s5108_s8 }
 0x281   :  { %3423 = vrot.lane.b32.xlu0 %v5780_v12, %s5108_s8 }
 0x283   :  { %2530 = vrot.lane.b32.xlu1 %v5824_v29, %s5103_s28 }
 0x285   :  { %2532 = vrot.lane.b32.xlu0 %v5828_v35, %s5103_s28 }
 0x287   :  { %2546 = vrot.lane.b32.xlu1 %v5832_v39, %s5103_s28 }
 0x289   :  { %2548 = vrot.lane.b32.xlu0 %v5836_v40, %s5103_s28 }
 0x28b   :  { %2458 = vrot.lane.b32.xlu1 %v5824_v29, %s5105_s0 }
 0x28d   :  { %2460 = vrot.lane.b32.xlu0 %v5828_v35, %s5105_s0 }
 0x28f   :  { %2474 = vrot.lane.b32.xlu1 %v5832_v39, %s5105_s0 }
 0x291   :  { %2476 = vrot.lane.b32.xlu0 %v5836_v40, %s5105_s0 }
 0x293   :  { %2847 = vrot.lane.b32.xlu1 %v5824_v29, %s5106_s29 }
 0x295   :  { %2849 = vrot.lane.b32.xlu0 %v5828_v35, %s5106_s29 }
 0x297   :  { %2863 = vrot.lane.b32.xlu1 %v5832_v39, %s5106_s29 }
 0x299   :  { %2865 = vrot.lane.b32.xlu0 %v5836_v40, %s5106_s29 }
 0x29b   :  { %3057 = vrot.lane.b32.xlu1 %v5824_v29, %s5107_s30 }
 0x29d   :  { %3059 = vrot.lane.b32.xlu0 %v5828_v35, %s5107_s30 }
 0x29f   :  { %3073 = vrot.lane.b32.xlu1 %v5832_v39, %s5107_s30 }
 0x2a1   :  { %3075 = vrot.lane.b32.xlu0 %v5836_v40, %s5107_s30 }
 0x2a3   :  { %3413 = vrot.lane.b32.xlu1 %v5824_v29, %s5108_s8 }
 0x2a5   :  { %3415 = vrot.lane.b32.xlu0 %v5828_v35, %s5108_s8 }
 0x2a7   :  { %3429 = vrot.lane.b32.xlu1 %v5832_v39, %s5108_s8 }
 0x2a9   :  { %3431 = vrot.lane.b32.xlu0 %v5836_v40, %s5108_s8 }
 0x2ab   :  { %2526 = vrot.lane.b32.xlu1 %v5872_v47, %s5103_s28 }
 0x2ad   :  { %2528 = vrot.lane.b32.xlu0 %v5876_v52, %s5103_s28 }
 0x2af   :  { %2542 = vrot.lane.b32.xlu1 %v5880_v2, %s5103_s28 }
 0x2b1   :  { %2544 = vrot.lane.b32.xlu0 %v5884_v60, %s5103_s28 }
 0x2b3   :  { %2454 = vrot.lane.b32.xlu1 %v5872_v47, %s5105_s0 }
 0x2b5   :  { %2456 = vrot.lane.b32.xlu0 %v5876_v52, %s5105_s0 }
 0x2b7   :  { %2470 = vrot.lane.b32.xlu1 %v5880_v2, %s5105_s0 }
 0x2b9   :  { %2472 = vrot.lane.b32.xlu0 %v5884_v60, %s5105_s0 }
 0x2bb   :  { %2843 = vrot.lane.b32.xlu1 %v5872_v47, %s5106_s29 }
 0x2bd   :  { %2845 = vrot.lane.b32.xlu0 %v5876_v52, %s5106_s29 }
 0x2bf   :  { %2859 = vrot.lane.b32.xlu1 %v5880_v2, %s5106_s29 }
 0x2c1   :  { %2861 = vrot.lane.b32.xlu0 %v5884_v60, %s5106_s29 }
 0x2c3   :  { %3053 = vrot.lane.b32.xlu1 %v5872_v47, %s5107_s30 }
 0x2c5   :  { %3055 = vrot.lane.b32.xlu0 %v5876_v52, %s5107_s30 }
 0x2c7   :  { %3069 = vrot.lane.b32.xlu1 %v5880_v2, %s5107_s30 }
 0x2c9   :  { %3071 = vrot.lane.b32.xlu0 %v5884_v60, %s5107_s30 }
 0x2cb   :  { %3409 = vrot.lane.b32.xlu1 %v5872_v47, %s5108_s8 }
 0x2cd   :  { %v5927_v54 = vpop.permute.xlu1 %2522  ;;  %3411 = vrot.lane.b32.xlu0 %v5876_v52, %s5108_s8 }
 0x2cf   :  { %v5935_v4 = vpop.permute.xlu0 %2524  ;;  %3425 = vrot.lane.b32.xlu1 %v5880_v2, %s5108_s8 }
 0x2d1   :  { %v2539_v25 = vpop.permute.xlu1 %2538  ;;  %3427 = vrot.lane.b32.xlu0 %v5884_v60, %s5108_s8 }
 0x2d3   :  { %v2541_v7 = vpop.permute.xlu0 %2540  ;;  %2534 = vrot.lane.b32.xlu1 %v5941_v24, %s5103_s28 }
 0x2d5   :  { %v5952_v38 = vpop.permute.xlu1 %2450  ;;  %2536 = vrot.lane.b32.xlu0 %v5946_v28, %s5103_s28 }
 0x2d7   :  { %v5958_v15 = vpop.permute.xlu0 %2452  ;;  %2550 = vrot.lane.b32.xlu1 %v5950_v34, %s5103_s28 }
 0x2d9   :  { %v5962_v27 = vpop.permute.xlu1 %2466  ;;  %2552 = vrot.lane.b32.xlu0 %v5956_v9, %s5103_s28 }
 0x2db   :  { %v5966_v41 = vpop.permute.xlu0 %2468  ;;  %3615 = vrot.lane.b32.xlu1 %v5770_v3, %s5109_s9 }
 0x2dd   :  { %v5970_v16 = vpop.permute.xlu1 %2839  ;;  %3617 = vrot.lane.b32.xlu0 %v5772_v55, %s5109_s9 }
 0x2df   :  { %v5974_v46 = vpop.permute.xlu0 %2841  ;;  %2462 = vrot.lane.b32.xlu1 %v5941_v24, %s5105_s0 }
 0x2e1   :  { %v5978_v48 = vpop.permute.xlu1 %2855  ;;  %3625 = vrot.lane.b32.xlu0 %v5828_v35, %s5109_s9 }
 0x2e3   :  { %v5982_v53 = vpop.permute.xlu0 %2857  ;;  %2478 = vrot.lane.b32.xlu1 %v5950_v34, %s5105_s0 }
 0x2e5   :  { %v5986_v63 = vpop.permute.xlu1 %3049  ;;  %2464 = vrot.lane.b32.xlu0 %v5946_v28, %s5105_s0 }
 0x2e6   :  { %7132 = vst [vmem:[#allocation30_spill] sm:$0xff] %v5986_v63 }
 0x2e7   :  { %v5990_v59 = vpop.permute.xlu0 %3051  ;;  %2851 = vrot.lane.b32.xlu1 %v5941_v24, %s5106_s29 }
 0x2e9   :  { %v5994_v10 = vpop.permute.xlu1 %3065  ;;  %2480 = vrot.lane.b32.xlu0 %v5956_v9, %s5105_s0 }
 0x2eb   :  { %v5998_v14 = vpop.permute.xlu0 %3067  ;;  %2867 = vrot.lane.b32.xlu1 %v5950_v34, %s5106_s29 }
 0x2ec   :  { %7133 = vst [vmem:[#allocation31_spill] sm:$0xff] %v5998_v14 }
 0x2ed   :  { %v6002_v19 = vpop.permute.xlu1 %3405  ;;  %3633 = vrot.lane.b32.xlu0 %v5780_v12, %s5109_s9 }
 0x2ee   :  { %7134 = vst [vmem:[#allocation32_spill] sm:$0xff] %v6002_v19 }
 0x2ef   :  { %v6006_v6 = vpop.permute.xlu0 %3407  ;;  %3061 = vrot.lane.b32.xlu1 %v5941_v24, %s5107_s30 }
 0x2f0   :  { %7135 = vst [vmem:[#allocation33_spill] sm:$0xff] %v6006_v6 }
 0x2f1   :  { %v6010_v8 = vpop.permute.xlu1 %3421  ;;  %3641 = vrot.lane.b32.xlu0 %v5836_v40, %s5109_s9 }
 0x2f2   :  { %7136 = vst [vmem:[#allocation34_spill] sm:$0xff] %v6010_v8 }
 0x2f3   :  { %v6014_v31 = vpop.permute.xlu0 %3423  ;;  %3077 = vrot.lane.b32.xlu1 %v5950_v34, %s5107_s30 }
 0x2f4   :  { %7137 = vst [vmem:[#allocation35_spill] sm:$0xff] %v6014_v31 }
 0x2f5   :  { %v2531_v30 = vpop.permute.xlu1 %2530  ;;  %2853 = vrot.lane.b32.xlu0 %v5946_v28, %s5106_s29 }
 0x2f6   :  { %v2562_v0 = vsel %vm204_vm1, %v5927_v54, %v2531_v30  ;;  %v2558_v61 = vsel %vm204_vm1, %v2531_v30, %v2539_v25 }
 0x2f7   :  { %v2533_v5 = vpop.permute.xlu0 %2532  ;;  %3417 = vrot.lane.b32.xlu1 %v5941_v24, %s5108_s8  ;;  %v2571_v18 = vmul.f32 %v2562_v0, %v5269_v20 }
 0x2f8   :  { %v2563_v51 = vsel %vm204_vm1, %v5935_v4, %v2533_v5  ;;  %v2559_v57 = vsel %vm204_vm1, %v2533_v5, %v2541_v7 }
 0x2f9   :  { %v2575_v37 = vmul.f32 %v2563_v51, %v5269_v20  ;;  %v2547_v13 = vpop.permute.xlu1 %2546  ;;  %2869 = vrot.lane.b32.xlu0 %v5956_v9, %s5106_s29  ;;  %v2576_v51 = vmul.f32 %v2559_v57, %v5278_v23 }
 0x2fa   :  { %v2554_v50 = vsel %vm204_vm1, %v2539_v25, %v2547_v13  ;;  %v2566_v62 = vsel %vm204_vm1, %v2547_v13, %v5927_v54 }
 0x2fb   :  { %v2549_v0 = vpop.permute.xlu0 %2548  ;;  %3433 = vrot.lane.b32.xlu1 %v5950_v34, %s5108_s8  ;;  %v2587_v5 = vpack.c.bf16 %v2575_v37, %v2571_v18  ;;  %v2570_v45 = vmul.f32 %v2566_v62, %v5275_v22  ;;  %v2573_v13 = vmul.f32 %v2554_v50, %v5272_v21  ;;  %v2572_v62 = vmul.f32 %v2558_v61, %v5278_v23 }
 0x2fc   :  { %v2555_v44 = vsel %vm204_vm1, %v2541_v7, %v2549_v0  ;;  %v2567_v14 = vsel %vm204_vm1, %v2549_v0, %v5935_v4 }
 0x2fd   :  { %v2574_v30 = vmul.f32 %v2567_v14, %v5275_v22  ;;  %v2577_v54 = vmul.f32 %v2555_v44, %v5272_v21  ;;  %v6053_v25 = vpop.permute.xlu1 %2458  ;;  %2611 = vmatprep.subr.bf16.mxu0 %v2587_v5  ;;  %3621 = vrot.lane.b32.xlu0 %v5876_v52, %s5109_s9  ;;  %v2588_v50 = vpack.c.bf16 %v2576_v51, %v2572_v62 }
 0x2ff   :  { %v2586_v37 = vpack.c.bf16 %v2574_v30, %v2570_v45  ;;  %v6058_v57 = vpop.permute.xlu0 %2460  ;;  %3623 = vrot.lane.b32.xlu1 %v5824_v29, %s5109_s9  ;;  %v2589_v18 = vpack.c.bf16 %v2577_v54, %v2573_v13 }
 0x301   :  { %v6062_v4 = vpop.permute.xlu1 %2474  ;;  %2612 = vmatpush1.bf16.msra.mxu0 %v2586_v37  ;;  %2664 = vmatprep.subr.bf16.mxu1 %v2589_v18 }
 0x302   :  { %3637 = vrot.lane.b32.xlu0 %v5884_v60, %s5109_s9  ;;  %2665 = vmatpush1.bf16.msra.mxu1 %v2588_v50 }
 0x303   :  { %v6066_v44 = vpop.permute.xlu0 %2476  ;;  %3631 = vrot.lane.b32.xlu1 %v5776_v1, %s5109_s9 }
 0x305   :  { %v6070_v45 = vpop.permute.xlu1 %2847 }
 0x306   :  { %3063 = vrot.lane.b32.xlu0 %v5946_v28, %s5107_s30 }
 0x307   :  { %v6074_v61 = vpop.permute.xlu0 %2849  ;;  %3639 = vrot.lane.b32.xlu1 %v5832_v39, %s5109_s9 }
 0x309   :  { %v6078_v7 = vpop.permute.xlu1 %2863 }
 0x30a   :  { %3079 = vrot.lane.b32.xlu0 %v5956_v9, %s5107_s30 }
 0x30b   :  { %v6082_v14 = vpop.permute.xlu0 %2865  ;;  %3619 = vrot.lane.b32.xlu1 %v5872_v47, %s5109_s9 }
 0x30d   :  { %v6086_v0 = vpop.permute.xlu1 %3057 }
 0x30e   :  { %3827 = vrot.lane.b32.xlu0 %v5772_v55, %s5110_s10 }
 0x30f   :  { %v6090_v5 = vpop.permute.xlu0 %3059  ;;  %3627 = vrot.lane.b32.xlu1 %v5941_v24, %s5109_s9 }
 0x311   :  { %v6094_v51 = vpop.permute.xlu1 %3073 }
 0x312   :  { %7138 = vst [vmem:[#allocation36_spill] sm:$0xff] %v6094_v51  ;;  %3835 = vrot.lane.b32.xlu0 %v5828_v35, %s5110_s10 }
 0x313   :  { %v6098_v13 = vpop.permute.xlu0 %3075  ;;  %3635 = vrot.lane.b32.xlu1 %v5880_v2, %s5109_s9 }
 0x314   :  { %7139 = vst [vmem:[#allocation37_spill] sm:$0xff] %v6098_v13 }
 0x315   :  { %v6102_v30 = vpop.permute.xlu1 %3413 }
 0x316   :  { %7140 = vst [vmem:[#allocation38_spill] sm:$0xff] %v6102_v30  ;;  %3843 = vrot.lane.b32.xlu0 %v5780_v12, %s5110_s10 }
 0x317   :  { %v6106_v54 = vpop.permute.xlu0 %3415  ;;  %3643 = vrot.lane.b32.xlu1 %v5950_v34, %s5109_s9 }
 0x318   :  { %7141 = vst [vmem:[#allocation39_spill] sm:$0xff] %v6106_v54 }
 0x319   :  { %v3430_v62 = vpop.permute.xlu1 %3429 }
 0x31a   :  { %v3437_v37 = vsel %vm1366_vm6, %v6010_v8, %v3430_v62  ;;  %v3449_v18 = vsel %vm1366_vm6, %v3430_v62, %v6002_v19  ;;  %3851 = vrot.lane.b32.xlu0 %v5836_v40, %s5110_s10 }
 0x31b   :  { %v3432_v50 = vpop.permute.xlu0 %3431  ;;  %3825 = vrot.lane.b32.xlu1 %v5770_v3, %s5110_s10  ;;  %v6127_v8 = vmul.f32 %v3437_v37, %v5526_v58  ;;  %v6130_v62 = vmul.f32 %v3449_v18, %v5474_v36 }
 0x31c   :  { %v3438_v30 = vsel %vm1366_vm6, %v6014_v31, %v3432_v50  ;;  %v3450_v54 = vsel %vm1366_vm6, %v3432_v50, %v6006_v6 }
 0x31d   :  { %7142 = vst [vmem:[#allocation40_spill] sm:$0xff] %v6127_v8  ;;  %7143 = vst [vmem:[#allocation41_spill] sm:$0xff] %v6130_v62  ;;  %v6133_v19 = vmul.f32 %v3438_v30, %v5526_v58  ;;  %v6136_v51 = vmul.f32 %v3450_v54, %v5474_v36  ;;  %v2527_v13 = vpop.permute.xlu1 %2526 }
 0x31e   :  { %3831 = vrot.lane.b32.xlu0 %v5876_v52, %s5110_s10 }
 0x31f   :  { %7144 = vst [vmem:[#allocation42_spill] sm:$0xff] %v6133_v19  ;;  %7145 = vst [vmem:[#allocation43_spill] sm:$0xff] %v6136_v51  ;;  %3833 = vrot.lane.b32.xlu1 %v5824_v29, %s5110_s10  ;;  %v6144_v37 = vpop.permute.xlu0 %2528 }
 0x321   :  { %v2543_v30 = vpop.permute.xlu1 %2542 }
 0x322   :  { %3847 = vrot.lane.b32.xlu0 %v5884_v60, %s5110_s10 }
 0x323   :  { %3841 = vrot.lane.b32.xlu1 %v5776_v1, %s5110_s10  ;;  %v2545_v54 = vpop.permute.xlu0 %2544 }
 0x325   :  { %v6152_v50 = vpop.permute.xlu1 %2454 }
 0x326   :  { %3419 = vrot.lane.b32.xlu0 %v5946_v28, %s5108_s8 }
 0x327   :  { %3849 = vrot.lane.b32.xlu1 %v5832_v39, %s5110_s10  ;;  %v6158_v31 = vpop.permute.xlu0 %2456 }
 0x329   :  { %v6160_v36 = vpop.permute.xlu1 %2470 }
 0x32a   :  { %3435 = vrot.lane.b32.xlu0 %v5956_v9, %s5108_s8 }
 0x32b   :  { %3829 = vrot.lane.b32.xlu1 %v5872_v47, %s5110_s10  ;;  %v6166_v18 = vpop.permute.xlu0 %2472 }
 0x32d   :  { %v6168_v58 = vpop.permute.xlu1 %2843 }
 0x32e   :  { %4037 = vrot.lane.b32.xlu0 %v5772_v55, %s5111_s11 }
 0x32f   :  { %3837 = vrot.lane.b32.xlu1 %v5941_v24, %s5110_s10  ;;  %v6174_v8 = vpop.permute.xlu0 %2845 }
 0x330   :  { %7146 = vst [vmem:[#allocation44_spill] sm:$0xff] %v6174_v8 }
 0x331   :  { %v6176_v19 = vpop.permute.xlu1 %2859 }
 0x332   :  { %7147 = vst [vmem:[#allocation45_spill] sm:$0xff] %v6176_v19  ;;  %4045 = vrot.lane.b32.xlu0 %v5828_v35, %s5111_s11 }
 0x333   :  { %3845 = vrot.lane.b32.xlu1 %v5880_v2, %s5110_s10  ;;  %v6182_v6 = vpop.permute.xlu0 %2861 }
 0x334   :  { %7148 = vst [vmem:[#allocation46_spill] sm:$0xff] %v6182_v6 }
 0x335   :  { %v6184_v62 = vpop.permute.xlu1 %3053 }
 0x336   :  { %7149 = vst [vmem:[#allocation47_spill] sm:$0xff] %v6184_v62  ;;  %3629 = vrot.lane.b32.xlu0 %v5946_v28, %s5109_s9 }
 0x337   :  { %3853 = vrot.lane.b32.xlu1 %v5950_v34, %s5110_s10  ;;  %v6190_v51 = vpop.permute.xlu0 %3055 }
 0x338   :  { %7150 = vst [vmem:[#allocation48_spill] sm:$0xff] %v6190_v51 }
 0x339   :  { %v6192_v55 = vpop.permute.xlu1 %3069 }
 0x33a   :  { %7151 = vst [vmem:[#allocation49_spill] sm:$0xff] %v6192_v55  ;;  %3645 = vrot.lane.b32.xlu0 %v5956_v9, %s5109_s9 }
 0x33b   :  { %4035 = vrot.lane.b32.xlu1 %v5770_v3, %s5111_s11  ;;  %v6198_v35 = vpop.permute.xlu0 %3071 }
 0x33c   :  { %7152 = vst [vmem:[#allocation50_spill] sm:$0xff] %v6198_v35 }
 0x33d   :  { %v6200_v19 = vpop.permute.xlu1 %3409 }
 0x33e   :  { %7153 = vst [vmem:[#allocation51_spill] sm:$0xff] %v6200_v19  ;;  %4053 = vrot.lane.b32.xlu0 %v5780_v12, %s5111_s11  ;;  %v2490_v12 = vsel %vm167_vm2, %v5952_v38, %v6053_v25 }
 0x33f   :  { %4043 = vrot.lane.b32.xlu1 %v5824_v29, %s5111_s11  ;;  %v6206_v62 = vpop.permute.xlu0 %3411 }
 0x340   :  { %7154 = vst [vmem:[#allocation52_spill] sm:$0xff] %v6206_v62  ;;  %v2491_v62 = vsel %vm167_vm2, %v5958_v15, %v6058_v57 }
 0x341   :  { %v6208_v51 = vpop.permute.xlu1 %3425  ;;  %v2503_v6 = vmul.f32 %v2491_v62, %v5282_v26 }
 0x342   :  { %7155 = vst [vmem:[#allocation53_spill] sm:$0xff] %v6208_v51  ;;  %4061 = vrot.lane.b32.xlu0 %v5836_v40, %s5111_s11 }
 0x343   :  { %4051 = vrot.lane.b32.xlu1 %v5776_v1, %s5111_s11  ;;  %v6214_v3 = vpop.permute.xlu0 %3427 }
 0x344   :  { %7156 = vst [vmem:[#allocation54_spill] sm:$0xff] %v6214_v3 }
 0x345   :  { %v2535_v35 = vpop.permute.xlu1 %2534 }
 0x346   :  { %v2564_v19 = vsel %vm204_vm1, %v2527_v13, %v2535_v35  ;;  %3839 = vrot.lane.b32.xlu0 %v5946_v28, %s5110_s10 }
 0x347   :  { %4059 = vrot.lane.b32.xlu1 %v5832_v39, %s5111_s11  ;;  %v2537_v51 = vpop.permute.xlu0 %2536  ;;  %v2579_v1 = vmul.f32 %v2564_v19, %v5269_v20  ;;  %v2487_v39 = vsel %vm167_vm2, %v6058_v57, %v5966_v41  ;;  %v2560_v19 = vsel %vm204_vm1, %v2535_v35, %v2543_v30 }
 0x348   :  { %v2565_v3 = vsel %vm204_vm1, %v6144_v37, %v2537_v51  ;;  %v2561_v40 = vsel %vm204_vm1, %v2537_v51, %v2545_v54  ;;  %v2495_v51 = vsel %vm167_vm2, %v6066_v44, %v5958_v15  ;;  %v2494_v15 = vsel %vm167_vm2, %v6062_v4, %v5952_v38 }
 0x349   :  { %v2583_v29 = vmul.f32 %v2565_v3, %v5269_v20  ;;  %v2551_v55 = vpop.permute.xlu1 %2550  ;;  %v2482_v20 = vsel %vm167_vm2, %v5962_v27, %v6062_v4  ;;  %v2483_v3 = vsel %vm167_vm2, %v5966_v41, %v6066_v44  ;;  %v2504_v38 = vmul.f32 %v2487_v39, %v5302_v43 }
 0x34a   :  { %v2556_v8 = vsel %vm204_vm1, %v2543_v30, %v2551_v55  ;;  %v2568_v63 = vsel %vm204_vm1, %v2551_v55, %v2527_v13  ;;  %3855 = vrot.lane.b32.xlu0 %v5956_v9, %s5110_s10  ;;  %v2584_v13 = vmul.f32 %v2561_v40, %v5278_v23  ;;  %v2486_v40 = vsel %vm167_vm2, %v6053_v25, %v5962_v27 }
 0x34b   :  { %4039 = vrot.lane.b32.xlu1 %v5872_v47, %s5111_s11  ;;  %v2553_v55 = vpop.permute.xlu0 %2552  ;;  %v2591_v57 = vpack.c.bf16 %v2583_v29, %v2579_v1  ;;  %v2578_v35 = vmul.f32 %v2568_v63, %v5275_v22  ;;  %v2581_v30 = vmul.f32 %v2556_v8, %v5272_v21  ;;  %v2505_v63 = vmul.f32 %v2483_v3, %v5314_v49 }
 0x34c   :  { %v2557_v62 = vsel %vm204_vm1, %v2545_v54, %v2553_v55  ;;  %v2569_v41 = vsel %vm204_vm1, %v2553_v55, %v6144_v37  ;;  %v2580_v8 = vmul.f32 %v2560_v19, %v5278_v23  ;;  %v2501_v4 = vmul.f32 %v2482_v20, %v5314_v49  ;;  %v5057_v23 = vld [vmem:[%s7035_s4 + $0x10] sm:$0xff]  }
 0x34d   :  { %v2582_v1 = vmul.f32 %v2569_v41, %v5275_v22  ;;  %v2585_v29 = vmul.f32 %v2557_v62, %v5272_v21  ;;  %v6274_v47 = vpop.permute.xlu1 %3615  ;;  %2613 = vmatprep.subr.bf16.mxu0 %v2591_v57  ;;  %v2499_v21 = vmul.f32 %v2490_v12, %v5282_v26  ;;  %v2502_v22 = vmul.f32 %v2495_v51, %v5299_v42 }
 0x34e   :  { %4041 = vrot.lane.b32.xlu0 %v5876_v52, %s5111_s11  ;;  %v2592_v37 = vpack.c.bf16 %v2584_v13, %v2580_v8  ;;  %v2498_v12 = vmul.f32 %v2494_v15, %v5299_v42  ;;  %v2500_v19 = vmul.f32 %v2486_v40, %v5302_v43  ;;  %v2517_v39 = vpack.c.bf16 %v2505_v63, %v2501_v4  ;;  %v4245_v40 = vld [vmem:[%s7036_s5] sm:$0xff]  ;;  %v5058_v15 = vld [vmem:[%s7035_s4 + $0x18] sm:$0xff]  }
 0x34f   :  { %v2590_v44 = vpack.c.bf16 %v2582_v1, %v2578_v35  ;;  %4047 = vrot.lane.b32.xlu1 %v5941_v24, %s5111_s11  ;;  %v6292_v27 = vpop.permute.xlu0 %3617  ;;  %v2593_v25 = vpack.c.bf16 %v2585_v29, %v2581_v30  ;;  %v2515_v3 = vpack.c.bf16 %v2503_v6, %v2499_v21  ;;  %v2880_v62 = vsel %vm622_vm4, %v5974_v46, %v6074_v61 }
 0x350   :  { %v2514_v20 = vpack.c.bf16 %v2502_v22, %v2498_v12  ;;  %v2516_v57 = vpack.c.bf16 %v2504_v38, %v2500_v19  ;;  %v7157_v35 = vmov 0   ;;  %v2875_v30 = vsel %vm622_vm4, %v6070_v45, %v5978_v48 }
 0x351   :  { %v2463_v54 = vpop.permute.xlu1 %2462  ;;  %2614 = vmatpush1.bf16.msra.mxu0 %v2590_v44  ;;  %2666 = vmatprep.subr.bf16.mxu1 %v2593_v25  ;;  %v2879_v1 = vsel %vm622_vm4, %v5970_v16, %v6070_v45  ;;  %v2876_v44 = vsel %vm622_vm4, %v6074_v61, %v5982_v53  ;;  %v2892_v25 = vmul.f32 %v2880_v62, %v5323_v56 }
 0x352   :  { %4057 = vrot.lane.b32.xlu0 %v5884_v60, %s5111_s11  ;;  %2667 = vmatpush1.bf16.msra.mxu1 %v2592_v37  ;;  %v2492_v13 = vsel %vm167_vm2, %v6152_v50, %v2463_v54  ;;  %v2884_v61 = vsel %vm622_vm4, %v6082_v14, %v5974_v46  ;;  %v4246_v37 = vld [vmem:[%s7036_s5 + $0x8] sm:$0xff] }
 0x353   :  { %2733 = vmatprep.subr.bf16.mxu0 %v2515_v3  ;;  %4055 = vrot.lane.b32.xlu1 %v5880_v2, %s5111_s11  ;;  %v6305_v55 = vpop.permute.xlu0 %3625  ;;  %v2507_v63 = vmul.f32 %v2492_v13, %v5282_v26  ;;  %v4248_v13 = vld [vmem:[%s7036_s5 + $0x18] sm:$0xff] }
 0x354   :  { %2786 = vmatprep.subr.bf16.mxu1 %v2517_v39  ;;  %v6311_v6 = vsel %vm1625_vm7, %v6292_v27, %v6305_v55  ;;  %4521 = vmatmul.mubr.msk.bf16.vlgmr.msra.gmra.mrb[8].mxu0 %vm2604_vm10, %v5057_v23 }
 0x355   :  { %v2479_v51 = vpop.permute.xlu1 %2478  ;;  %4523 = vmatmul.mubr.msk.bf16.vlgmr.msra.gmra.mrb[8].mxu1 %vm2604_vm10, %v5057_v23  ;;  %2734 = vmatpush1.bf16.msra.mxu0 %v2514_v20 }
 0x356   :  { %4049 = vrot.lane.b32.xlu0 %v5946_v28, %s5111_s11  ;;  %2787 = vmatpush1.bf16.msra.mxu1 %v2516_v57  ;;  %v2496_v45 = vsel %vm167_vm2, %v2479_v51, %v6152_v50  ;;  %v2871_v50 = vsel %vm622_vm4, %v5978_v48, %v6078_v7  ;;  %v2484_v38 = vsel %vm167_vm2, %v6160_v36, %v2479_v51 }
 0x357   :  { %4063 = vrot.lane.b32.xlu1 %v5950_v34, %s5111_s11  ;;  %v2465_v41 = vpop.permute.xlu0 %2464  ;;  %2653 = vmatprep.mubr.bf16.mxu0 %v7157_v35  ;;  %v2488_v48 = vsel %vm167_vm2, %v2463_v54, %v6160_v36  ;;  %v2506_v12 = vmul.f32 %v2496_v45, %v5299_v42  ;;  %v4247_v36 = vld [vmem:[%s7036_s5 + $0x10] sm:$0xff] }
 0x358   :  { %v2493_v29 = vsel %vm167_vm2, %v6158_v31, %v2465_v41  ;;  %2706 = vmatprep.mubr.bf16.mxu1 %v7157_v35  ;;  %v2489_v8 = vsel %vm167_vm2, %v2465_v41, %v6166_v18  ;;  %v2508_v20 = vmul.f32 %v2488_v48, %v5302_v43  ;;  %v4285_v41 = vld [vmem:[%s7037_s6] sm:$0xff]  ;;  %v4288_v48 = vld [vmem:[%s7037_s6 + $0x18] sm:$0xff] }
 0x359   :  { %v2511_v21 = vmul.f32 %v2493_v29, %v5282_v26  ;;  %v6353_v22 = vpop.permute.xlu1 %2851  ;;  %v2872_v26 = vsel %vm622_vm4, %v5982_v53, %v6082_v14  ;;  %v2512_v53 = vmul.f32 %v2489_v8, %v5302_v43  ;;  %v2509_v14 = vmul.f32 %v2484_v38, %v5314_v49 }
 0x35a   :  { %4065 = vrot.lane.b32.xlu0 %v5956_v9, %s5111_s11  ;;  %v2890_v43 = vmul.f32 %v2871_v50, %v5344_v17  ;;  %v2881_v38 = vsel %vm622_vm4, %v6168_v58, %v6353_v22 }
 0x35b   :  { %4251 = vperm.xlu1 %5018, %v4245_v40   ;;  %v2481_v4 = vpop.permute.xlu0 %2480  ;;  %v2519_v23 = vpack.c.bf16 %v2511_v21, %v2507_v63  ;;  %v2520_v62 = vpack.c.bf16 %v2512_v53, %v2508_v20  ;;  %v2889_v63 = vmul.f32 %v2875_v30, %v5366_v33  ;;  %v4287_v30 = vld [vmem:[%s7037_s6 + $0x10] sm:$0xff] }
 0x35c   :  { %v2485_v3 = vsel %vm167_vm2, %v6166_v18, %v2481_v4  ;;  %v2497_v46 = vsel %vm167_vm2, %v2481_v4, %v6158_v31  ;;  %4522 = vmatmul.mubr.msk.bf16.gmra.mrb[12].mxu0 %vm2604_vm10, %v5058_v15  ;;  %v2883_v31 = vsel %vm622_vm4, %v6078_v7, %v5970_v16  ;;  %v2894_v18 = vmul.f32 %v2872_v26, %v5344_v17  ;;  %v7160_v53 = vld [vmem:[#allocation31_spill] sm:$0xff] }
 0x35d   :  { %v2510_v54 = vmul.f32 %v2497_v46, %v5299_v42  ;;  %v2513_v19 = vmul.f32 %v2485_v3, %v5314_v49  ;;  %v6398_v39 = vpop.permute.xlu1 %2867  ;;  %4524 = vmatmul.mubr.msk.bf16.gmra.mrb[12].mxu1 %vm2604_vm10, %v5058_v15  ;;  %2735 = vmatprep.subr.bf16.mxu0 %v2519_v23  ;;  %v2888_v42 = vmul.f32 %v2879_v1, %v5323_v56  ;;  %v5059_v1 = vld [vmem:[%s7035_s4] sm:$0xff]   ;;  %v7161_v46 = vld [vmem:[#allocation44_spill] sm:$0xff] }
 0x35e   :  { %4256 = vperm.xlu0 %5017, %v4246_v37   ;;  %2765 = vmatprep.mubr.bf16.mxu0 %v7157_v35  ;;  %v2891_v49 = vmul.f32 %v2884_v61, %v5363_v32  ;;  %v2893_v7 = vmul.f32 %v2876_v44, %v5366_v33  ;;  %v2887_v29 = vmul.f32 %v2883_v31, %v5363_v32  ;;  %v4286_v44 = vld [vmem:[%s7037_s6 + $0x8] sm:$0xff] }
 0x35f   :  { %v2518_v57 = vpack.c.bf16 %v2510_v54, %v2506_v12  ;;  %4261 = vperm.xlu1 %5018, %v4247_v36   ;;  %v6410_v51 = vpop.permute.xlu0 %3633  ;;  %v2521_v16 = vpack.c.bf16 %v2513_v19, %v2509_v14  ;;  %2818 = vmatprep.mubr.bf16.mxu1 %v7157_v35  ;;  %v2904_v15 = vpack.c.bf16 %v2892_v25, %v2888_v42  ;;  %v7158_v37 = vld [vmem:[#allocation30_spill] sm:$0xff]  ;;  %v7159_v12 = vld [vmem:[#allocation37_spill] sm:$0xff] }
 0x360   :  { %v2906_v45 = vpack.c.bf16 %v2894_v18, %v2890_v43  ;;  %v2903_v8 = vpack.c.bf16 %v2891_v49, %v2887_v29  ;;  %v2905_v50 = vpack.c.bf16 %v2893_v7, %v2889_v63  ;;  %v3090_v26 = vsel %vm881_vm5, %v5990_v59, %v6090_v5  ;;  %v5060_v14 = vld [vmem:[%s7035_s4 + $0x8] sm:$0xff]   ;;  %v7163_v49 = vld [vmem:[#allocation5_spill] sm:$0xff] }
 0x361   :  { %v6425_v40 = vpop.permute.xlu1 %3061  ;;  %2736 = vmatpush1.bf16.msra.mxu0 %v2518_v57  ;;  %2788 = vmatprep.subr.bf16.mxu1 %v2521_v16  ;;  %v3085_v4 = vsel %vm881_vm5, %v6086_v0, %v5994_v10  ;;  %v3089_v23 = vsel %vm881_vm5, %v7158_v37, %v6086_v0  ;;  %v3082_v3 = vsel %vm881_vm5, %v7160_v53, %v7159_v12  ;;  %v7162_v19 = vld [vmem:[#allocation46_spill] sm:$0xff]  ;;  %v7165_v16 = vld [vmem:[#allocation45_spill] sm:$0xff] }
 0x362   :  { %4266 = vperm.xlu0 %5017, %v4248_v13   ;;  %2789 = vmatpush1.bf16.msra.mxu1 %v2520_v62  ;;  %v2896_v54 = vmul.f32 %v2881_v38, %v5323_v56  ;;  %v2885_v0 = vsel %vm622_vm4, %v6398_v39, %v6168_v58  ;;  %v3086_v42 = vsel %vm881_vm5, %v6090_v5, %v7160_v53  ;;  %v7164_v13 = vld [vmem:[#allocation36_spill] sm:$0xff]  ;;  %v7166_v43 = vld [vmem:[#allocation6_spill] sm:$0xff] }
 0x363   :  { %2927 = vmatprep.subr.bf16.mxu0 %v2904_v15  ;;  %4291 = vperm.xlu1 %5018, %v4285_v41   ;;  %v6428_v21 = vpop.permute.xlu0 %3641  ;;  %v3102_v57 = vmul.f32 %v3090_v26, %v7163_v49  ;;  %v3081_v58 = vsel %vm881_vm5, %v5994_v10, %v7164_v13  ;;  %v2873_v7 = vsel %vm622_vm4, %v7165_v16, %v6398_v39 }
 0x364   :  { %2980 = vmatprep.subr.bf16.mxu1 %v2906_v45  ;;  %4527 = vmatmul.mubr.msk.bf16.vlgmr.msra.gmra.mrb[8].mxu0 %vm2604_vm10, %v5059_v1  ;;  %v3104_v5 = vmul.f32 %v3082_v3, %v7166_v43  ;;  %v2877_v62 = vsel %vm622_vm4, %v6353_v22, %v7165_v16  ;;  %v2898_v15 = vmul.f32 %v2873_v7, %v5344_v17 }
 0x365   :  { %v6437_v25 = vpop.permute.xlu1 %3077  ;;  %4529 = vmatmul.mubr.msk.bf16.vlgmr.msra.gmra.mrb[8].mxu1 %vm2604_vm10, %v5059_v1  ;;  %2928 = vmatpush1.bf16.msra.mxu0 %v2903_v8  ;;  %v2895_v1 = vmul.f32 %v2885_v0, %v5363_v32  ;;  %v3098_v8 = vmul.f32 %v3089_v23, %v7163_v49  ;;  %v7169_v0 = vld [vmem:[#allocation15_spill] sm:$0xff] }
 0x366   :  { %4296 = vperm.xlu0 %5017, %v4286_v44   ;;  %2981 = vmatpush1.bf16.msra.mxu1 %v2905_v50  ;;  %v3093_v44 = vsel %vm881_vm5, %v7164_v13, %v7158_v37  ;;  %v2897_v50 = vmul.f32 %v2877_v62, %v5366_v33  ;;  %v7171_v13 = vld [vmem:[#allocation47_spill] sm:$0xff]  ;;  %v3660_v62 = vsel %vm1625_vm7, %v6428_v21, %v6292_v27 }
 0x367   :  { %4301 = vperm.xlu1 %5018, %v4287_v30   ;;  %v2854_v61 = vpop.permute.xlu0 %2853  ;;  %2775 = vmatprep.mubr.bf16.mxu0 %v7157_v35  ;;  %v3114_v53 = vpack.c.bf16 %v3102_v57, %v3098_v8  ;;  %v7174_v8 = vld [vmem:[#allocation13_spill] sm:$0xff] }
 0x368   :  { %v2882_v36 = vsel %vm622_vm4, %v7161_v46, %v2854_v61  ;;  %2828 = vmatprep.mubr.bf16.mxu1 %v7157_v35  ;;  %v2878_v31 = vsel %vm622_vm4, %v2854_v61, %v7162_v19 }
 0x369   :  { %v2900_v18 = vmul.f32 %v2882_v36, %v5323_v56  ;;  %v6480_v20 = vpop.permute.xlu1 %3417  ;;  %v3094_v56 = vsel %vm881_vm5, %v7159_v12, %v5990_v59  ;;  %v2901_v29 = vmul.f32 %v2878_v31, %v5366_v33  ;;  %v5061_v33 = vld [vmem:[%s7035_s4 + $0x20] sm:$0xff]  }
 0x36a   :  { %4306 = vperm.xlu0 %5017, %v4288_v48   ;;  %v7168_v48 = vld [vmem:[#allocation8_spill] sm:$0xff] }
 0x36b   :  { %v2870_v41 = vpop.permute.xlu0 %2869  ;;  %v2908_v10 = vpack.c.bf16 %v2900_v18, %v2896_v54  ;;  %v3103_v23 = vmul.f32 %v3086_v42, %v7168_v48  ;;  %v2909_v12 = vpack.c.bf16 %v2901_v29, %v2897_v50  ;;  %v3099_v36 = vmul.f32 %v3085_v4, %v7168_v48  ;;  %v7170_v4 = vld [vmem:[#allocation49_spill] sm:$0xff]  ;;  %v7173_v29 = vld [vmem:[#allocation48_spill] sm:$0xff] }
 0x36c   :  { %v2874_v39 = vsel %vm622_vm4, %v7162_v19, %v2870_v41  ;;  %v2886_v59 = vsel %vm622_vm4, %v2870_v41, %v7161_v46  ;;  %4528 = vmatmul.mubr.msk.bf16.gmra.mrb[12].mxu0 %vm2604_vm10, %v5060_v14  ;;  %v6545_v19 = vmul.f32 %v6311_v6, %v7169_v0  ;;  %v3087_v57 = vsel %vm881_vm5, %v6425_v40, %v7170_v4 }
 0x36d   :  { %v2899_v22 = vmul.f32 %v2886_v59, %v5363_v32  ;;  %v2902_v63 = vmul.f32 %v2874_v39, %v5344_v17  ;;  %v6516_v45 = vpop.permute.xlu1 %3433  ;;  %4530 = vmatmul.mubr.msk.bf16.gmra.mrb[12].mxu1 %vm2604_vm10, %v5060_v14  ;;  %2929 = vmatprep.subr.bf16.mxu0 %v2908_v10  ;;  %v3100_v17 = vmul.f32 %v3081_v58, %v7166_v43  ;;  %v7167_v32 = vld [vmem:[#allocation7_spill] sm:$0xff]  ;;  %v7172_v10 = vld [vmem:[#allocation50_spill] sm:$0xff] }
 0x36e   :  { %2959 = vmatprep.mubr.bf16.mxu0 %v7157_v35  ;;  %3012 = vmatprep.mubr.bf16.mxu1 %v7157_v35  ;;  %v3101_v30 = vmul.f32 %v3094_v56, %v7167_v32  ;;  %v3097_v37 = vmul.f32 %v3093_v44, %v7167_v32  ;;  %v3115_v18 = vpack.c.bf16 %v3103_v23, %v3099_v36 }
 0x36f   :  { %v2907_v38 = vpack.c.bf16 %v2899_v22, %v2895_v1  ;;  %v6529_v26 = vpop.permute.xlu0 %3621  ;;  %v2910_v61 = vpack.c.bf16 %v2902_v63, %v2898_v15  ;;  %v3116_v46 = vpack.c.bf16 %v3104_v5, %v3100_v17  ;;  %v3091_v6 = vsel %vm881_vm5, %v7171_v13, %v6425_v40  ;;  %v5062_v40 = vld [vmem:[%s7035_s4 + $0x28] sm:$0xff]  }
 0x370   :  { %v3113_v54 = vpack.c.bf16 %v3101_v30, %v3097_v37  ;;  %v3106_v7 = vmul.f32 %v3091_v6, %v7163_v49  ;;  %v3107_v56 = vmul.f32 %v3087_v57, %v7168_v48  ;;  %v3095_v41 = vsel %vm881_vm5, %v6437_v25, %v7171_v13  ;;  %v7179_v13 = vld [vmem:[#allocation27_spill] sm:$0xff]  ;;  %v7180_v6 = vld [vmem:[#allocation28_spill] sm:$0xff] }
 0x371   :  { %v6536_v3 = vpop.permute.xlu1 %3623  ;;  %2930 = vmatpush1.bf16.msra.mxu0 %v2907_v38  ;;  %2982 = vmatprep.subr.bf16.mxu1 %v2910_v61  ;;  %v3083_v27 = vsel %vm881_vm5, %v7170_v4, %v6437_v25  ;;  %v6603_v50 = vmul.f32 %v3660_v62, %v7174_v8  ;;  %v3105_v17 = vmul.f32 %v3095_v41, %v7167_v32  ;;  %v7178_v4 = vld [vmem:[#allocation39_spill] sm:$0xff]  ;;  %v7183_v41 = vld [vmem:[#allocation21_spill] sm:$0xff] }
 0x372   :  { %v3655_v14 = vsel %vm1625_vm7, %v6274_v47, %v6536_v3  ;;  %2983 = vmatpush1.bf16.msra.mxu1 %v2909_v12  ;;  %3137 = vmatprep.subr.bf16.mxu0 %v3114_v53 }
 0x373   :  { %v6548_v31 = vmul.f32 %v3655_v14, %v7169_v0  ;;  %3190 = vmatprep.subr.bf16.mxu1 %v3116_v46  ;;  %v7175_v14 = vld [vmem:[#allocation25_spill] sm:$0xff] }
 0x374   :  { %v6550_v42 = vpop.permute.xlu0 %3637  ;;  %4533 = vmatmul.mubr.msk.bf16.vlgmr.msra.gmra.mrb[8].mxu0 %vm2604_vm10, %v5061_v33 }
 0x375   :  { %v3679_v58 = vpack.c.bf16 %v6545_v19, %v6548_v31  ;;  %v6563_v16 = vpop.permute.xlu1 %3631  ;;  %4535 = vmatmul.mubr.msk.bf16.vlgmr.msra.gmra.mrb[8].mxu1 %vm2604_vm10, %v5061_v33  ;;  %3138 = vmatpush1.bf16.msra.mxu0 %v3113_v54  ;;  %v7176_v54 = vld [vmem:[#allocation26_spill] sm:$0xff] }
 0x376   :  { %3191 = vmatpush1.bf16.msra.mxu1 %v3115_v18  ;;  %2969 = vmatprep.mubr.bf16.mxu0 %v7157_v35  ;;  %v3260_v18 = vpack.c.bf16 %v7176_v54, %v7175_v14  ;;  %v7194_v54 = vld [vmem:[#allocation11_spill] sm:$0xff] }
 0x377   :  { %3022 = vmatprep.mubr.bf16.mxu1 %v7157_v35 }
 0x378   :  { %v3064_v5 = vpop.permute.xlu0 %3063 }
 0x379   :  { %v3088_v1 = vsel %vm881_vm5, %v3064_v5, %v7172_v10  ;;  %v3092_v39 = vsel %vm881_vm5, %v7173_v29, %v3064_v5  ;;  %v6587_v59 = vpop.permute.xlu1 %3639  ;;  %v7182_v5 = vld [vmem:[#allocation38_spill] sm:$0xff] }
 0x37a   :  { %v3110_v15 = vmul.f32 %v3092_v39, %v7163_v49  ;;  %v3111_v22 = vmul.f32 %v3088_v1, %v7168_v48  ;;  %v3659_v63 = vsel %vm1625_vm7, %v6587_v59, %v6274_v47  ;;  %v3108_v49 = vmul.f32 %v3083_v27, %v7166_v43 }
 0x37b   :  { %v6600_v44 = vmul.f32 %v3659_v63, %v7174_v8  ;;  %v7187_v63 = vld [vmem:[#allocation24_spill] sm:$0xff] }
 0x37c   :  { %v3119_v30 = vpack.c.bf16 %v3111_v22, %v3107_v56  ;;  %v3080_v38 = vpop.permute.xlu0 %3079  ;;  %4534 = vmatmul.mubr.msk.bf16.gmra.mrb[12].mxu0 %vm2604_vm10, %v5062_v40  ;;  %v3118_v25 = vpack.c.bf16 %v3110_v15, %v3106_v7  ;;  %v3262_v7 = vpack.c.bf16 %v7180_v6, %v7179_v13  ;;  %v7181_v56 = vld [vmem:[#allocation34_spill] sm:$0xff]  ;;  %v3264_v15 = vpack.c.bf16 %v5946_v28, %v5941_v24  ;;  %v7186_v22 = vld [vmem:[#allocation23_spill] sm:$0xff] }
 0x37d   :  { %v3084_v61 = vsel %vm881_vm5, %v7172_v10, %v3080_v38  ;;  %v3096_v47 = vsel %vm881_vm5, %v3080_v38, %v7173_v29  ;;  %v6614_v48 = vpop.permute.xlu1 %3619  ;;  %4536 = vmatmul.mubr.msk.bf16.gmra.mrb[12].mxu1 %vm2604_vm10, %v5062_v40  ;;  %3169 = vmatprep.mubr.bf16.mxu0 %v7157_v35  ;;  %v3682_v53 = vpack.c.bf16 %v6603_v50, %v6600_v44  ;;  %v7184_v10 = vld [vmem:[#allocation22_spill] sm:$0xff] }
 0x37e   :  { %v3109_v23 = vmul.f32 %v3096_v47, %v7167_v32  ;;  %v3112_v12 = vmul.f32 %v3084_v61, %v7166_v43  ;;  %3139 = vmatprep.subr.bf16.mxu0 %v3118_v25  ;;  %3222 = vmatprep.mubr.bf16.mxu1 %v7157_v35  ;;  %v5063_v32 = vld [vmem:[%s7035_s4 + $0x30] sm:$0xff]   ;;  %v3441_v40 = vsel %vm1366_vm6, %v7182_v5, %v7181_v56  ;;  %v7185_v29 = vld [vmem:[#allocation10_spill] sm:$0xff] }
 0x37f   :  { %v7177_v43 = vld [vmem:[#allocation35_spill] sm:$0xff]  ;;  %v3259_v1 = vpack.c.bf16 %v7184_v10, %v7183_v41  ;;  %v3454_v38 = vmul.f32 %v3441_v40, %v7185_v29  ;;  %v3265_v28 = vpack.c.bf16 %v5884_v60, %v5880_v2  ;;  %v3651_v40 = vsel %vm1625_vm7, %v6536_v3, %v6563_v16  ;;  %v7196_v41 = vld [vmem:[#allocation53_spill] sm:$0xff] }
 0x380   :  { %v3117_v33 = vpack.c.bf16 %v3109_v23, %v3105_v17  ;;  %v6623_v37 = vpop.permute.xlu0 %3827  ;;  %v3120_v46 = vpack.c.bf16 %v3112_v12, %v3108_v49  ;;  %v3442_v57 = vsel %vm1366_vm6, %v7178_v4, %v7177_v43  ;;  %v3261_v17 = vpack.c.bf16 %v7187_v63, %v7186_v22  ;;  %v7188_v49 = vld [vmem:[#allocation29_spill] sm:$0xff] }
 0x381   :  { %v6625_v36 = vpop.permute.xlu1 %3627  ;;  %v3458_v39 = vmul.f32 %v3442_v57, %v7185_v29  ;;  %v3263_v61 = vpack.c.bf16 %v5876_v52, %v7188_v49  ;;  %v7190_v23 = vld [vmem:[#allocation41_spill] sm:$0xff]  ;;  %v3443_v10 = vsel %vm1366_vm6, %v6480_v20, %v7196_v41  ;;  %v3652_v22 = vsel %vm1625_vm7, %v6305_v55, %v6410_v51 }
 0x382   :  { %3140 = vmatpush1.bf16.msra.mxu0 %v3117_v33  ;;  %3192 = vmatprep.subr.bf16.mxu1 %v3120_v46  ;;  %v7192_v33 = vld [vmem:[#allocation33_spill] sm:$0xff]  ;;  %v7193_v46 = vld [vmem:[#allocation32_spill] sm:$0xff]  ;;  %v3657_v44 = vsel %vm1625_vm7, %v6614_v48, %v6625_v36 }
 0x383   :  { %3193 = vmatpush1.bf16.msra.mxu1 %v3119_v30  ;;  %3283 = vmatprep.subr.bf16.mxu0 %v3260_v18  ;;  %v3266_v30 = vpack.c.bf16 %v5956_v9, %v5950_v34  ;;  %v3470_v47 = vpack.c.bf16 %v3458_v39, %v3454_v38  ;;  %v5064_v34 = vld [vmem:[%s7035_s4 + $0x38] sm:$0xff]   ;;  %v7189_v9 = vld [vmem:[#allocation43_spill] sm:$0xff]  ;;  %v3446_v2 = vsel %vm1366_vm6, %v7192_v33, %v7178_v4  ;;  %v5065_v4 = vld [vmem:[%s7035_s4 + $0x40] sm:$0xff]  }
 0x384   :  { %3336 = vmatprep.subr.bf16.mxu1 %v3262_v7  ;;  %v6642_v62 = vpop.permute.xlu0 %3835  ;;  %v7191_v52 = vpack.c.bf16 %v7189_v9, %v7190_v23  ;;  %v3445_v14 = vsel %vm1366_vm6, %v7193_v46, %v7182_v5  ;;  %v3457_v18 = vmul.f32 %v3446_v2, %v7194_v54  ;;  %v7195_v7 = vld [vmem:[#allocation51_spill] sm:$0xff]  ;;  %v7198_v39 = vld [vmem:[#allocation40_spill] sm:$0xff]  ;;  %v7201_v38 = vld [vmem:[#allocation54_spill] sm:$0xff] }
 0x385   :  { %4539 = vmatmul.mubr.msk.bf16.vlgmr.msra.gmra.mrb[8].mxu0 %vm2604_vm10, %v5063_v32  ;;  %v6648_v27 = vpop.permute.xlu1 %3635  ;;  %v3453_v57 = vmul.f32 %v3445_v14, %v7194_v54  ;;  %v3447_v56 = vsel %vm1366_vm6, %v7195_v7, %v6480_v20  ;;  %v3439_v20 = vsel %vm1366_vm6, %v7196_v41, %v6516_v45  ;;  %v3451_v9 = vsel %vm1366_vm6, %v6516_v45, %v7195_v7  ;;  %v7203_v2 = vld [vmem:[#allocation12_spill] sm:$0xff] }
 0x386   :  { %4541 = vmatmul.mubr.msk.bf16.vlgmr.msra.gmra.mrb[8].mxu1 %vm2604_vm10, %v5063_v32  ;;  %3284 = vmatpush1.bf16.msra.mxu0 %v3259_v1  ;;  %v7197_v1 = vld [vmem:[#allocation42_spill] sm:$0xff]  ;;  %v3461_v3 = vmul.f32 %v3447_v56, %v7194_v54  ;;  %v3463_v46 = vmul.f32 %v3439_v20, %v7203_v2  ;;  %v3647_v7 = vsel %vm1625_vm7, %v6563_v16, %v6587_v59  ;;  %v7205_v59 = vld [vmem:[#allocation16_spill] sm:$0xff] }
 0x387   :  { %3285 = vmatprep.subr.bf16.mxu0 %v3264_v15  ;;  %3337 = vmatpush1.bf16.msra.mxu1 %v3261_v17  ;;  %v3469_v13 = vpack.c.bf16 %v3457_v18, %v3453_v57  ;;  %v7199_v15 = vpack.c.bf16 %v7197_v1, %v7198_v39  ;;  %v7200_v17 = vld [vmem:[#allocation14_spill] sm:$0xff]  ;;  %v7204_v57 = vld [vmem:[#allocation9_spill] sm:$0xff]  ;;  %v3653_v50 = vsel %vm1625_vm7, %v6625_v36, %v6648_v27 }
 0x388   :  { %3338 = vmatprep.subr.bf16.mxu1 %v3266_v30  ;;  %v6658_v25 = vpop.permute.xlu0 %3843  ;;  %3179 = vmatprep.mubr.bf16.mxu0 %v7157_v35  ;;  %v3664_v30 = vmul.f32 %v3651_v40, %v7200_v17  ;;  %v3668_v33 = vmul.f32 %v3652_v22, %v7200_v17  ;;  %v7206_v36 = vld [vmem:[#allocation18_spill] sm:$0xff] }
 0x389   :  { %v6663_v24 = vpop.permute.xlu1 %3643  ;;  %3232 = vmatprep.mubr.bf16.mxu1 %v7157_v35  ;;  %v3862_v19 = vsel %vm1884_vm8, %v6642_v62, %v6658_v25 }
 0x38a   :  { %3286 = vmatpush1.bf16.msra.mxu0 %v3263_v61  ;;  %v7202_v61 = vld [vmem:[#allocation52_spill] sm:$0xff]  ;;  %v3649_v31 = vsel %vm1625_vm7, %v6648_v27, %v6663_v24 }
 0x38b   :  { %3339 = vmatpush1.bf16.msra.mxu1 %v3265_v28  ;;  %3493 = vmatprep.subr.bf16.mxu0 %v3470_v47  ;;  %v5066_v47 = vld [vmem:[%s7035_s4 + $0x48] sm:$0xff]   ;;  %v5068_v27 = vld [vmem:[%s7035_s4 + $0x58] sm:$0xff]  }
 0x38c   :  { %3546 = vmatprep.subr.bf16.mxu1 %v7191_v52  ;;  %v6674_v12 = vpop.permute.xlu0 %3851 }
 0x38d   :  { %4540 = vmatmul.mubr.msk.bf16.gmra.mrb[12].mxu0 %vm2604_vm10, %v5064_v34  ;;  %v6681_v60 = vpop.permute.xlu1 %3825 }
 0x38e   :  { %4542 = vmatmul.mubr.msk.bf16.gmra.mrb[12].mxu1 %vm2604_vm10, %v5064_v34  ;;  %3315 = vmatprep.mubr.bf16.mxu0 %v7157_v35  ;;  %v3462_v34 = vmul.f32 %v3443_v10, %v7185_v29  ;;  %v3648_v10 = vsel %vm1625_vm7, %v6410_v51, %v6428_v21 }
 0x38f   :  { %3368 = vmatprep.mubr.bf16.mxu1 %v7157_v35 }
 0x390   :  { %v6691_v32 = vpop.permute.xlu0 %3831 }
 0x391   :  { %v6693_v43 = vpop.permute.xlu1 %3833 }
 0x394   :  { %v6699_v6 = vpop.permute.xlu0 %3847 }
 0x395   :  { %4545 = vmatmul.mubr.msk.bf16.vlgmr.msra.gmra.mrb[8].mxu0 %vm2604_vm10, %v5065_v4  ;;  %v6706_v5 = vpop.permute.xlu1 %3841 }
 0x396   :  { %3494 = vmatpush1.bf16.msra.mxu0 %v3469_v13  ;;  %4547 = vmatmul.mubr.msk.bf16.vlgmr.msra.gmra.mrb[8].mxu1 %vm2604_vm10, %v5065_v4  ;;  %v3464_v13 = vmul.f32 %v3451_v9, %v7204_v57  ;;  %v3878_v9 = vmul.f32 %v3862_v19, %v7206_v36 }
 0x397   :  { %3547 = vmatpush1.bf16.msra.mxu1 %v7199_v15  ;;  %3325 = vmatprep.mubr.bf16.mxu0 %v7157_v35  ;;  %v3665_v15 = vmul.f32 %v3647_v7, %v7205_v59 }
 0x398   :  { %v3420_v63 = vpop.permute.xlu0 %3419  ;;  %3378 = vmatprep.mubr.bf16.mxu1 %v7157_v35 }
 0x399   :  { %v3444_v49 = vsel %vm1366_vm6, %v3420_v63, %v7201_v38  ;;  %v3448_v55 = vsel %vm1366_vm6, %v7202_v61, %v3420_v63  ;;  %v6738_v28 = vpop.permute.xlu1 %3849  ;;  %v3669_v63 = vmul.f32 %v3648_v10, %v7205_v59 }
 0x39a   :  { %v3465_v23 = vmul.f32 %v3448_v55, %v7194_v54  ;;  %v3466_v52 = vmul.f32 %v3444_v49, %v7185_v29  ;;  %v3680_v54 = vpack.c.bf16 %v3668_v33, %v3664_v30  ;;  %v3861_v30 = vsel %vm1884_vm8, %v6693_v43, %v6706_v5 }
 0x39b   :  { %v3681_v21 = vpack.c.bf16 %v3669_v63, %v3665_v15  ;;  %v3869_v33 = vsel %vm1884_vm8, %v6738_v28, %v6681_v60 }
 0x39c   :  { %v3473_v14 = vpack.c.bf16 %v3465_v23, %v3461_v3  ;;  %v3436_v18 = vpop.permute.xlu0 %3435  ;;  %v3474_v4 = vpack.c.bf16 %v3466_v52, %v3462_v34  ;;  %v5067_v3 = vld [vmem:[%s7035_s4 + $0x50] sm:$0xff]   ;;  %v3673_v23 = vmul.f32 %v3649_v31, %v7205_v59 }
 0x39d   :  { %v3440_v56 = vsel %vm1366_vm6, %v7201_v38, %v3436_v18  ;;  %v3452_v45 = vsel %vm1366_vm6, %v3436_v18, %v7202_v61  ;;  %4546 = vmatmul.mubr.msk.bf16.gmra.mrb[12].mxu0 %vm2604_vm10, %v5066_v47  ;;  %v6760_v29 = vpop.permute.xlu1 %3829  ;;  %v3874_v38 = vmul.f32 %v3861_v30, %v7206_v36  ;;  %v3857_v18 = vsel %vm1884_vm8, %v6706_v5, %v6738_v28  ;;  %v7208_v28 = vld [vmem:[#allocation19_spill] sm:$0xff] }
 0x39e   :  { %v3467_v40 = vmul.f32 %v3440_v56, %v7203_v2  ;;  %v3468_v41 = vmul.f32 %v3452_v45, %v7204_v57  ;;  %4548 = vmatmul.mubr.msk.bf16.gmra.mrb[12].mxu1 %vm2604_vm10, %v5066_v47  ;;  %3495 = vmatprep.subr.bf16.mxu0 %v3474_v4  ;;  %v3870_v2 = vsel %vm1884_vm8, %v6674_v12, %v6623_v37 }
 0x39f   :  { %3496 = vmatpush1.bf16.msra.mxu0 %v3473_v14  ;;  %3525 = vmatprep.mubr.bf16.mxu0 %v7157_v35 }
 0x3a0   :  { %v3475_v1 = vpack.c.bf16 %v3467_v40, %v3463_v46  ;;  %v6774_v39 = vpop.permute.xlu0 %4037  ;;  %3703 = vmatprep.subr.bf16.mxu0 %v3680_v54  ;;  %v3476_v16 = vpack.c.bf16 %v3468_v41, %v3464_v13  ;;  %3578 = vmatprep.mubr.bf16.mxu1 %v7157_v35 }
 0x3a1   :  { %v6778_v22 = vpop.permute.xlu1 %3837 }
 0x3a2   :  { %3548 = vmatprep.subr.bf16.mxu1 %v3476_v16  ;;  %v3867_v30 = vsel %vm1884_vm8, %v6760_v29, %v6778_v22 }
 0x3a3   :  { %3549 = vmatpush1.bf16.msra.mxu1 %v3475_v1 }
 0x3a4   :  { %3756 = vmatprep.subr.bf16.mxu1 %v3682_v53  ;;  %v6787_v51 = vpop.permute.xlu0 %4045 }
 0x3a5   :  { %4551 = vmatmul.mubr.msk.bf16.vlgmr.msra.gmra.mrb[8].mxu0 %vm2604_vm10, %v5067_v3  ;;  %v6790_v20 = vpop.permute.xlu1 %3845 }
 0x3a6   :  { %3704 = vmatpush1.bf16.msra.mxu0 %v3679_v58  ;;  %4553 = vmatmul.mubr.msk.bf16.vlgmr.msra.gmra.mrb[8].mxu1 %vm2604_vm10, %v5067_v3  ;;  %v3661_v58 = vsel %vm1625_vm7, %v6663_v24, %v6614_v48  ;;  %v3671_v48 = vmul.f32 %v3657_v44, %v7169_v0  ;;  %v3672_v24 = vmul.f32 %v3653_v50, %v7200_v17 }
 0x3a7   :  { %3757 = vmatpush1.bf16.msra.mxu1 %v3681_v21  ;;  %3535 = vmatprep.mubr.bf16.mxu0 %v7157_v35  ;;  %v3674_v52 = vmul.f32 %v3661_v58, %v7174_v8  ;;  %v3863_v44 = vsel %vm1884_vm8, %v6778_v22, %v6790_v20  ;;  %v6913_v22 = vld [vmem:[%s7032_s1 + $0x28] ss:$0 sm:$0xff] }
 0x3a8   :  { %v3630_v53 = vpop.permute.xlu0 %3629  ;;  %3588 = vmatprep.mubr.bf16.mxu1 %v7157_v35 }
 0x3a9   :  { %v3654_v49 = vsel %vm1625_vm7, %v3630_v53, %v6550_v42  ;;  %v3658_v61 = vsel %vm1625_vm7, %v6529_v26, %v3630_v53  ;;  %v3854_v55 = vpop.permute.xlu1 %3853 }
 0x3aa   :  { %v3675_v47 = vmul.f32 %v3658_v61, %v7169_v0  ;;  %v3676_v34 = vmul.f32 %v3654_v49, %v7200_v17  ;;  %v3865_v0 = vsel %vm1884_vm8, %v6681_v60, %v6693_v43  ;;  %v3890_v60 = vpack.c.bf16 %v3878_v9, %v3874_v38  ;;  %v7207_v43 = vld [vmem:[#allocation17_spill] sm:$0xff]  ;;  %v5070_v49 = vld [vmem:[%s7035_s4 + $0x68] sm:$0xff]  }
 0x3ab   :  { %v3876_v56 = vmul.f32 %v3869_v33, %v7207_v43  ;;  %v3880_v5 = vmul.f32 %v3870_v2, %v7207_v43  ;;  %v3859_v50 = vsel %vm1884_vm8, %v6790_v20, %v3854_v55  ;;  %v3871_v19 = vsel %vm1884_vm8, %v3854_v55, %v6760_v29 }
 0x3ac   :  { %v3683_v17 = vpack.c.bf16 %v3675_v47, %v3671_v48  ;;  %v3646_v46 = vpop.permute.xlu0 %3645  ;;  %v3684_v14 = vpack.c.bf16 %v3676_v34, %v3672_v24  ;;  %v3881_v61 = vmul.f32 %v3867_v30, %v7208_v28  ;;  %v3882_v55 = vmul.f32 %v3863_v44, %v7206_v36 }
 0x3ad   :  { %v3650_v4 = vsel %vm1625_vm7, %v6550_v42, %v3646_v46  ;;  %v3662_v57 = vsel %vm1625_vm7, %v3646_v46, %v6529_v26  ;;  %4552 = vmatmul.mubr.msk.bf16.gmra.mrb[12].mxu0 %vm2604_vm10, %v5068_v27  ;;  %v4036_v13 = vpop.permute.xlu1 %4035  ;;  %v3866_v42 = vsel %vm1884_vm8, %v6623_v37, %v6642_v62  ;;  %v3858_v26 = vsel %vm1884_vm8, %v6658_v25, %v6674_v12  ;;  %v7209_v37 = vld [vmem:[#allocation20_spill] sm:$0xff]  ;;  %v5069_v25 = vld [vmem:[%s7035_s4 + $0x60] sm:$0xff]  }
 0x3ae   :  { %v3677_v45 = vmul.f32 %v3650_v4, %v7205_v59  ;;  %v3678_v54 = vmul.f32 %v3662_v57, %v7174_v8  ;;  %4554 = vmatmul.mubr.msk.bf16.gmra.mrb[12].mxu1 %vm2604_vm10, %v5068_v27  ;;  %3705 = vmatprep.subr.bf16.mxu0 %v3684_v14  ;;  %v3873_v8 = vmul.f32 %v3865_v0, %v7208_v28  ;;  %v5076_v4 = vld [vmem:[%s7032_s1 + $0x38] ss:$0 sm:$0xff] }
 0x3af   :  { %3706 = vmatpush1.bf16.msra.mxu0 %v3683_v17  ;;  %3735 = vmatprep.mubr.bf16.mxu0 %v7157_v35  ;;  %v3875_v62 = vmul.f32 %v3857_v18, %v7209_v37  ;;  %v3877_v12 = vmul.f32 %v3866_v42, %v7208_v28  ;;  %v3892_v1 = vpack.c.bf16 %v3880_v5, %v3876_v56 }
 0x3b0   :  { %v3685_v7 = vpack.c.bf16 %v3677_v45, %v3673_v23  ;;  %v6877_v40 = vpop.permute.xlu0 %4053  ;;  %3913 = vmatprep.subr.bf16.mxu0 %v3890_v60  ;;  %v3686_v41 = vpack.c.bf16 %v3678_v54, %v3674_v52  ;;  %3788 = vmatprep.mubr.bf16.mxu1 %v7157_v35  ;;  %v3879_v16 = vmul.f32 %v3858_v26, %v7209_v37 }
 0x3b1   :  { %v4044_v10 = vpop.permute.xlu1 %4043  ;;  %v3889_v59 = vpack.c.bf16 %v3877_v12, %v3873_v8  ;;  %v4072_v31 = vsel %vm2143_vm9, %v6787_v51, %v6877_v40  ;;  %v3883_v24 = vmul.f32 %v3859_v50, %v7209_v37  ;;  %v3884_v47 = vmul.f32 %v3871_v19, %v7207_v43 }
 0x3b2   :  { %3758 = vmatprep.subr.bf16.mxu1 %v3686_v41  ;;  %v3891_v3 = vpack.c.bf16 %v3879_v16, %v3875_v62  ;;  %v4088_v34 = vmul.f32 %v6913_v22, %v4072_v31  ;;  %v4075_v23 = vsel %vm2143_vm9, %v4036_v13, %v4044_v10 }
 0x3b3   :  { %3759 = vmatpush1.bf16.msra.mxu1 %v3685_v7 }
 0x3b4   :  { %3966 = vmatprep.subr.bf16.mxu1 %v3892_v1  ;;  %v4062_v15 = vpop.permute.xlu0 %4061 }
 0x3b5   :  { %4557 = vmatmul.mubr.msk.bf16.vlgmr.msra.gmra.mrb[8].mxu0 %vm2604_vm10, %v5069_v25  ;;  %v4052_v63 = vpop.permute.xlu1 %4051  ;;  %v4080_v52 = vsel %vm2143_vm9, %v4062_v15, %v6774_v39  ;;  %v4068_v45 = vsel %vm2143_vm9, %v6877_v40, %v4062_v15 }
 0x3b6   :  { %3914 = vmatpush1.bf16.msra.mxu0 %v3889_v59  ;;  %v4071_v21 = vsel %vm2143_vm9, %v4044_v10, %v4052_v63  ;;  %4559 = vmatmul.mubr.msk.bf16.vlgmr.msra.gmra.mrb[8].mxu1 %vm2604_vm10, %v5069_v25 }
 0x3b7   :  { %3967 = vmatpush1.bf16.msra.mxu1 %v3891_v3  ;;  %3745 = vmatprep.mubr.bf16.mxu0 %v7157_v35  ;;  %v4084_v53 = vmul.f32 %v6913_v22, %v4071_v21 }
 0x3b8   :  { %v3840_v58 = vpop.permute.xlu0 %3839  ;;  %3798 = vmatprep.mubr.bf16.mxu1 %v7157_v35 }
 0x3b9   :  { %v3864_v20 = vsel %vm1884_vm8, %v3840_v58, %v6699_v6  ;;  %v3868_v29 = vsel %vm1884_vm8, %v6691_v32, %v3840_v58  ;;  %v4060_v38 = vpop.permute.xlu1 %4059  ;;  %v4100_v18 = vpack.c.bf16 %v4088_v34, %v4084_v53 }
 0x3ba   :  { %v3885_v27 = vmul.f32 %v3868_v29, %v7208_v28  ;;  %v3886_v48 = vmul.f32 %v3864_v20, %v7206_v36  ;;  %v4079_v9 = vsel %vm2143_vm9, %v4060_v38, %v4036_v13  ;;  %v4067_v36 = vsel %vm2143_vm9, %v4052_v63, %v4060_v38  ;;  %v5071_v28 = vld [vmem:[%s7035_s4 + $0x70] sm:$0xff]   ;;  %v5072_v63 = vld [vmem:[%s7035_s4 + $0x78] sm:$0xff]  }
 0x3bb   :  { %v4086_v57 = vmul.f32 %v5076_v4, %v4079_v9 }
 0x3bc   :  { %v3893_v33 = vpack.c.bf16 %v3885_v27, %v3881_v61  ;;  %v3856_v2 = vpop.permute.xlu0 %3855  ;;  %v3894_v0 = vpack.c.bf16 %v3886_v48, %v3882_v55  ;;  %v5074_v48 = vld [vmem:[%s7035_s4 + $0x88] sm:$0xff]   ;;  %s5112_s4 = smov [#allocation2]  }
 0x3bd   :  { %v3860_v17 = vsel %vm1884_vm8, %v6699_v6, %v3856_v2  ;;  %v3872_v46 = vsel %vm1884_vm8, %v3856_v2, %v6691_v32  ;;  %4558 = vmatmul.mubr.msk.bf16.gmra.mrb[12].mxu0 %vm2604_vm10, %v5070_v49  ;;  %v4040_v14 = vpop.permute.xlu1 %4039  ;;  %v4076_v32 = vsel %vm2143_vm9, %v6774_v39, %v6787_v51  ;;  %v5077_v6 = vld [vmem:[%s7032_s1 + $0x20] ss:$0 sm:$0xff]  ;;  %v5078_v39 = vld [vmem:[%s7032_s1 + $0x30] ss:$0 sm:$0xff]  ;;  %s4378_s29 = sshll.u32 %s5112_s4, 4  ;;  %s4379_s29 = int_to_ptr.vmem [resolvable:$true] %s4378_s29 }
 0x3be   :  { %v3887_v13 = vmul.f32 %v3860_v17, %v7209_v37  ;;  %v3888_v60 = vmul.f32 %v3872_v46, %v7207_v43  ;;  %4560 = vmatmul.mubr.msk.bf16.gmra.mrb[12].mxu1 %vm2604_vm10, %v5070_v49  ;;  %3915 = vmatprep.subr.bf16.mxu0 %v3894_v0  ;;  %v4083_v56 = vmul.f32 %v5077_v6, %v4075_v23  ;;  %s5079_s30 = scalar_lea.vmem %s4379_s29, 2048  ;;  %p5084_p1 = scmp.lt.s32.totalorder %s4379_s29, %s4379_s29 }
 0x3bf   :  { %3916 = vmatpush1.bf16.msra.mxu0 %v3893_v33  ;;  %3945 = vmatprep.mubr.bf16.mxu0 %v7157_v35  ;;  %v4090_v43 = vmul.f32 %v5076_v4, %v4080_v52  ;;  %v4085_v51 = vmul.f32 %v5078_v39, %v4067_v36  ;;  %v4087_v8 = vmul.f32 %v5077_v6, %v4076_v32  ;;  %p5080_p0 = scmp.ne.s32.totalorder %s4379_s29, %s5079_s30  ;;  %p5085_p2 = scmp.lt.s32.totalorder %s5079_s30, %s5079_s30 }
 0x3c0   :  { %v3895_v54 = vpack.c.bf16 %v3887_v13, %v3883_v24  ;;  %v4042_v42 = vpop.permute.xlu0 %4041  ;;  %4123 = vmatprep.subr.bf16.mxu0 %v4100_v18  ;;  %v3896_v26 = vpack.c.bf16 %v3888_v60, %v3884_v47  ;;  %3998 = vmatprep.mubr.bf16.mxu1 %v7157_v35  ;;  %v4089_v40 = vmul.f32 %v5078_v39, %v4068_v45 }
 0x3c1   :  { %v4048_v5 = vpop.permute.xlu1 %4047  ;;  %v4102_v7 = vpack.c.bf16 %v4090_v43, %v4086_v57  ;;  %v4099_v41 = vpack.c.bf16 %v4087_v8, %v4083_v56  ;;  %p5086_p3 = por %p5085_p2, %p5084_p1 }
 0x3c2   :  { %3968 = vmatprep.subr.bf16.mxu1 %v3896_v26  ;;  %v4101_v62 = vpack.c.bf16 %v4089_v40, %v4085_v51  ;;  %v4077_v25 = vsel %vm2143_vm9, %v4040_v14, %v4048_v5 }
 0x3c3   :  { %3969 = vmatpush1.bf16.msra.mxu1 %v3895_v54  ;;  %v4091_v16 = vmul.f32 %v5077_v6, %v4077_v25  ;;  %p5087_p4 = pnand %p5086_p3, %p5080_p0 }
 0x3c4   :  { %4176 = vmatprep.subr.bf16.mxu1 %v4102_v7  ;;  %v4058_v37 = vpop.permute.xlu0 %4057 }
 0x3c5   :  { %4563 = vmatmul.mubr.msk.bf16.vlgmr.msra.gmra.mrb[8].mxu0 %vm2604_vm10, %v5071_v28  ;;  %v4056_v10 = vpop.permute.xlu1 %4055 }
 0x3c6   :  { %4124 = vmatpush1.bf16.msra.mxu0 %v4099_v41  ;;  %4565 = vmatmul.mubr.msk.bf16.vlgmr.msra.gmra.mrb[8].mxu1 %vm2604_vm10, %v5071_v28  ;;  %v4073_v12 = vsel %vm2143_vm9, %v4048_v5, %v4056_v10 }
 0x3c7   :  { %4177 = vmatpush1.bf16.msra.mxu1 %v4101_v62  ;;  %3955 = vmatprep.mubr.bf16.mxu0 %v7157_v35  ;;  %v4092_v21 = vmul.f32 %v6913_v22, %v4073_v12 }
 0x3c8   :  { %v4050_v1 = vpop.permute.xlu0 %4049  ;;  %4008 = vmatprep.mubr.bf16.mxu1 %v7157_v35 }
 0x3c9   :  { %v4074_v59 = vsel %vm2143_vm9, %v4050_v1, %v4058_v37  ;;  %v4078_v15 = vsel %vm2143_vm9, %v4042_v42, %v4050_v1  ;;  %v4064_v3 = vpop.permute.xlu1 %4063 }
 0x3ca   :  { %v4095_v30 = vmul.f32 %v5077_v6, %v4078_v15  ;;  %v4096_v44 = vmul.f32 %v6913_v22, %v4074_v59  ;;  %v4069_v50 = vsel %vm2143_vm9, %v4056_v10, %v4064_v3  ;;  %v4081_v19 = vsel %vm2143_vm9, %v4064_v3, %v4040_v14 }
 0x3cb   :  { %v4093_v20 = vmul.f32 %v5078_v39, %v4069_v50  ;;  %v4094_v49 = vmul.f32 %v5076_v4, %v4081_v19 }
 0x3cc   :  { %v4103_v31 = vpack.c.bf16 %v4095_v30, %v4091_v16  ;;  %v4066_v58 = vpop.permute.xlu0 %4065  ;;  %v4104_v53 = vpack.c.bf16 %v4096_v44, %v4092_v21 }
 0x3cd   :  { %v4070_v29 = vsel %vm2143_vm9, %v4058_v37, %v4066_v58  ;;  %v4082_v38 = vsel %vm2143_vm9, %v4066_v58, %v4042_v42  ;;  %4564 = vmatmul.mubr.msk.bf16.gmra.mrb[12].mxu0 %vm2604_vm10, %v5072_v63 }
 0x3ce   :  { %v4097_v22 = vmul.f32 %v5078_v39, %v4070_v29  ;;  %v4098_v61 = vmul.f32 %v5076_v4, %v4082_v38  ;;  %4566 = vmatmul.mubr.msk.bf16.gmra.mrb[12].mxu1 %vm2604_vm10, %v5072_v63  ;;  %4125 = vmatprep.subr.bf16.mxu0 %v4104_v53 }
 0x3cf   :  { %4126 = vmatpush1.bf16.msra.mxu0 %v4103_v31  ;;  %4155 = vmatprep.mubr.bf16.mxu0 %v7157_v35 }
 0x3d0   :  { %v4105_v55 = vpack.c.bf16 %v4097_v22, %v4093_v20  ;;  %v4106_v27 = vpack.c.bf16 %v4098_v61, %v4094_v49  ;;  %4208 = vmatprep.mubr.bf16.mxu1 %v7157_v35 }
 0x3d2   :  { %4178 = vmatprep.subr.bf16.mxu1 %v4106_v27 }
 0x3d3   :  { %4179 = vmatpush1.bf16.msra.mxu1 %v4105_v55 }
 0x3d5   :  { %4569 = vmatmul.mubr.msk.bf16.vlgmr.msra.gmra.mrb[8].mxu0 %vm2604_vm10, %v5073_v11 }
 0x3d6   :  { %4571 = vmatmul.mubr.msk.bf16.vlgmr.msra.gmra.mrb[8].mxu1 %vm2604_vm10, %v5073_v11  ;;  %4165 = vmatprep.mubr.bf16.mxu0 %v7157_v35 }
 0x3d7   :  { %4218 = vmatprep.mubr.bf16.mxu1 %v7157_v35 }
 0x3da   :  { %v4252_v24 = vpop.permute.xlu1 %4251 }
 0x3dd   :  { %4570 = vmatmul.mubr.msk.bf16.gmra.mrb[12].mxu0 %vm2604_vm10, %v5074_v48  ;;  %v4257_v47 = vpop.permute.xlu0 %4256 }
 0x3de   :  { %4572 = vmatmul.mubr.msk.bf16.gmra.mrb[12].mxu1 %vm2604_vm10, %v5074_v48  ;;  %v4262_v34 = vpop.permute.xlu1 %4261 }
 0x3e1   :  { %v7013_v9 = vpop.permute.xlu0 %4266 }
 0x3e2   :  { %v4292_v23 = vpop.permute.xlu1 %4291 }
 0x3e5   :  { %v4297_v60 = vpop.permute.xlu0 %4296 }
 0x3e6   :  { %v4302_v37 = vpop.permute.xlu1 %4301 }
 0x3e9   :  { %v4307_v58 = vpop.permute.xlu0 %4306 }
 0x4a8   :  { %v4157_v52 = vpop.f32.mrb[8].mxu0 }
 0x4a9   :  { %v4573_v33 = vadd.f32 %v4252_v24, %v4157_v52  ;;  %v4159_v2 = vpop.f32.mrb[9].mxu0  ;;  %v4210_v0 = vpop.f32.mrb[8].mxu1 }
 0x4aa   :  { %v4575_v36 = vadd.f32 %v4252_v24, %v4159_v2  ;;  %v4589_v35 = vadd.f32 %v4252_v24, %v4210_v0  ;;  %v4161_v17 = vpop.f32.mrb[10].mxu0  ;;  %v4212_v46 = vpop.f32.mrb[9].mxu1 }
 0x4ab   :  { %v4574_v14 = vadd.f32 %v4573_v33, %v4292_v23  ;;  %v4577_v18 = vadd.f32 %v4257_v47, %v4161_v17  ;;  %v4591_v4 = vadd.f32 %v4252_v24, %v4212_v46  ;;  %v4163_v57 = vpop.f32.mrb[11].mxu0  ;;  %v4214_v13 = vpop.f32.mrb[10].mxu1 }
 0x4ac   :  { %v4576_v32 = vadd.f32 %v4575_v36, %v4292_v23  ;;  %v4590_v6 = vadd.f32 %v4589_v35, %v4292_v23  ;;  %v4579_v56 = vadd.f32 %v4257_v47, %v4163_v57  ;;  %v4593_v45 = vadd.f32 %v4257_v47, %v4214_v13  ;;  %v4216_v43 = vpop.f32.mrb[11].mxu1 }
 0x4ad   :  { %v4341_v54 = vmax.f32 %v4574_v14, 0.0  ;;  %v4578_v42 = vadd.f32 %v4577_v18, %v4297_v60  ;;  %v4592_v26 = vadd.f32 %v4591_v4, %v4292_v23  ;;  %v4595_v39 = vadd.f32 %v4257_v47, %v4216_v43 }
 0x4ae   :  { %v4342_v51 = vmax.f32 %v4576_v32, 0.0  ;;  %v4343_v5 = vmax.f32 %v4590_v6, 0.0  ;;  %v4580_v28 = vadd.f32 %v4579_v56, %v4297_v60  ;;  %v4594_v8 = vadd.f32 %v4593_v45, %v4297_v60 }
 0x4af   :  { %4357 = vst [vmem:[#allocation2] sm:$0xff] %v4341_v54  ;;  %v4345_v7 = vmax.f32 %v4578_v42, 0.0  ;;  %v4344_v40 = vmax.f32 %v4592_v26, 0.0  ;;  %v4596_v41 = vadd.f32 %v4595_v39, %v4297_v60 }
 0x4b0   :  { %4358 = vst [vmem:[#allocation2 + $0x8] sm:$0xff] %v4342_v51  ;;  %4359 = vst [vmem:[#allocation2 + $0x10] sm:$0xff] %v4343_v5  ;;  %v4346_v62 = vmax.f32 %v4580_v28, 0.0  ;;  %v4347_v10 = vmax.f32 %v4594_v8, 0.0  ;;  %v4167_v25 = vpop.f32.mrb[12].mxu0 }
 0x4b1   :  { %4361 = vst [vmem:[#allocation2 + $0x20] sm:$0xff] %v4345_v7  ;;  %4360 = vst [vmem:[#allocation2 + $0x18] sm:$0xff] %v4344_v40  ;;  %v4348_v12 = vmax.f32 %v4596_v41, 0.0  ;;  %v4581_v1 = vadd.f32 %v4262_v34, %v4167_v25  ;;  %v4169_v16 = vpop.f32.mrb[13].mxu0  ;;  %v4220_v59 = vpop.f32.mrb[12].mxu1 }
 0x4b2   :  { %4362 = vst [vmem:[#allocation2 + $0x28] sm:$0xff] %v4346_v62  ;;  %4363 = vst [vmem:[#allocation2 + $0x30] sm:$0xff] %v4347_v10  ;;  %v4583_v15 = vadd.f32 %v4262_v34, %v4169_v16  ;;  %v4597_v3 = vadd.f32 %v4262_v34, %v4220_v59  ;;  %v4171_v63 = vpop.f32.mrb[14].mxu0  ;;  %v4222_v21 = vpop.f32.mrb[13].mxu1 }
 0x4b3   :  { %4364 = vst [vmem:[#allocation2 + $0x38] sm:$0xff] %v4348_v12  ;;  %v4582_v30 = vadd.f32 %v4581_v1, %v4302_v37  ;;  %v4585_v44 = vadd.f32 %v7013_v9, %v4171_v63  ;;  %v4599_v50 = vadd.f32 %v4262_v34, %v4222_v21  ;;  %v4173_v19 = vpop.f32.mrb[15].mxu0  ;;  %v4224_v31 = vpop.f32.mrb[14].mxu1 }
 0x4b4   :  { %v4584_v53 = vadd.f32 %v4583_v15, %v4302_v37  ;;  %v4598_v20 = vadd.f32 %v4597_v3, %v4302_v37  ;;  %v4587_v29 = vadd.f32 %v7013_v9, %v4173_v19  ;;  %v4601_v38 = vadd.f32 %v7013_v9, %v4224_v31  ;;  %v4226_v49 = vpop.f32.mrb[15].mxu1 }
 0x4b5   :  { %v4349_v22 = vmax.f32 %v4582_v30, 0.0  ;;  %v4586_v61 = vadd.f32 %v4585_v44, %v4307_v58  ;;  %v4600_v55 = vadd.f32 %v4599_v50, %v4302_v37  ;;  %v4603_v27 = vadd.f32 %v7013_v9, %v4226_v49 }
 0x4b6   :  { %v4350_v11 = vmax.f32 %v4584_v53, 0.0  ;;  %v4351_v48 = vmax.f32 %v4598_v20, 0.0  ;;  %v4588_v24 = vadd.f32 %v4587_v29, %v4307_v58  ;;  %v4602_v47 = vadd.f32 %v4601_v38, %v4307_v58 }
 0x4b7   :  { %4365 = vst [vmem:[#allocation2 + $0x40] sm:$0xff] %v4349_v22  ;;  %v4353_v34 = vmax.f32 %v4586_v61, 0.0  ;;  %v4352_v23 = vmax.f32 %v4600_v55, 0.0  ;;  %v4604_v52 = vadd.f32 %v4603_v27, %v4307_v58 }
 0x4b8   :  { %4366 = vst [vmem:[#allocation2 + $0x48] sm:$0xff] %v4350_v11  ;;  %4367 = vst [vmem:[#allocation2 + $0x50] sm:$0xff] %v4351_v48  ;;  %v4354_v33 = vmax.f32 %v4588_v24, 0.0  ;;  %v4355_v2 = vmax.f32 %v4602_v47, 0.0 }
 0x4b9   :  { %4369 = vst [vmem:[#allocation2 + $0x60] sm:$0xff] %v4353_v34  ;;  %4368 = vst [vmem:[#allocation2 + $0x58] sm:$0xff] %v4352_v23  ;;  %v4356_v0 = vmax.f32 %v4604_v52, 0.0 }
 0x4ba   :  { %4370 = vst [vmem:[#allocation2 + $0x68] sm:$0xff] %v4354_v33  ;;  %4371 = vst [vmem:[#allocation2 + $0x70] sm:$0xff] %v4355_v2 }
 0x4bb   :  { %4372 = vst [vmem:[#allocation2 + $0x78] sm:$0xff] %v4356_v0 }
 0x4bc   :  { %5090 = shalt.err (!%p5087_p4)
}
 0x4bd   :  { %s5091_s10 = scalar_lea.hbm %s7038_s7, 2048 }
 0x4be   :  { %p5092_p5 = scmp.ne.s32.totalorder %s7038_s7, %s5091_s10  ;;  %p5095_p6 = scmp.lt.u32.totalorder %s5091_s10, %s7038_s7 }
 0x4c0   :  { %p5097_p7 = pnand %p5095_p6, %p5092_p5 }
 0x4c2   :  { %5100 = shalt.err (!%p5097_p7)
}
 0x4c3   :  { %s5113_s12 = smov 512   ;;  %s5114_s13 = smov 32  }
 0x4c4   :  { %4384 = dma.vmem_to_hbm [thread:$0]  %s4379_s29, 2048, %s7038_s7, [#allocation3], %s5113_s12, %s5113_s12, %s5114_s13  }
 0x4c5   :  { %5101 = dma.done.wait [#allocation3], 2048  }
 0x4c6   :  { %5102 = vsyncadd [#allocation3], 4294965248 }
 0x4c7   :  { %4388 = vsyncpa [#allocation3], 1 }

</bundles_post_ra>
